<compile_context>
chip_gen: v7x
topology: tpu7x:2x2x1
jax: 0.10.0
libtpu: 0.0.40
codegen_flags: <defaults>
</compile_context>

<pallas_src>
import math
from functools import partial

import jax
import jax.numpy as jnp
from jax.experimental import pallas as pl
from jax.experimental.pallas import tpu as pltpu


# ---------------------------------------------------------------------------
# Tiling / compiler-param helpers
# ---------------------------------------------------------------------------
_ROW_TILE_CAP = 256          # multiple of 8; good for 128/256-wide MXUs
_COL_TILE_CAP = 1536         # multiple of 128; keeps weight blocks small
_VMEM_LIMIT = 32 * 1024 * 1024


def _row_tile(m):
    """Row (sublane) tile: full dim if small, otherwise a capped multiple of 8.
    Ragged tails are handled by Pallas block masking (cdiv grids)."""
    if m <= _ROW_TILE_CAP:
        return m
    return _ROW_TILE_CAP


def _col_tile(n):
    """Column (lane) tile: full dim if small, else a 128-multiple divisor."""
    if n <= _COL_TILE_CAP:
        return n
    for t in (1536, 1024, 768, 512, 256, 128):
        if n % t == 0:
            return t
    return _COL_TILE_CAP


def _cparams(n_axes):
    return pltpu.CompilerParams(
        dimension_semantics=("parallel",) * n_axes,
        vmem_limit_bytes=_VMEM_LIMIT)


# ---------------------------------------------------------------------------
# Pallas kernels
# ---------------------------------------------------------------------------
_INV_SQRT2 = 1.0 / math.sqrt(2.0)


def _maybe_gelu(acc, activation):
    if activation == "gelu":  # exact (erf) GELU in f32, matching torch.nn.GELU
        acc = 0.5 * acc * (1.0 + jax.lax.erf(acc * jnp.float32(_INV_SQRT2)))
    return acc


def _layernorm_f32(x_f32, g_ref, b_ref, eps):
    mean = jnp.mean(x_f32, axis=-1, keepdims=True)
    var = jnp.mean(jnp.square(x_f32 - mean), axis=-1, keepdims=True)
    xn = (x_f32 - mean) * jax.lax.rsqrt(var + jnp.float32(eps))
    return xn * g_ref[...] + b_ref[...]


def _matmul_bias_kernel(x_ref, w_ref, b_ref, o_ref, *, activation):
    """x @ w + b (+ optional GELU); bf16 MXU operands, f32 accumulation."""
    x = x_ref[...].astype(w_ref.dtype)
    acc = jnp.dot(x, w_ref[...], preferred_element_type=jnp.float32)
    acc = acc + b_ref[...]
    o_ref[...] = _maybe_gelu(acc, activation).astype(o_ref.dtype)


def _ln_matmul_bias_kernel(x_ref, g_ref, bln_ref, w_ref, b_ref, o_ref,
                           *, eps, activation):
    """Fused LayerNorm(x) @ w + b (+ optional GELU)."""
    xn = _layernorm_f32(x_ref[...].astype(jnp.float32), g_ref, bln_ref, eps)
    acc = jnp.dot(xn.astype(w_ref.dtype), w_ref[...],
                  preferred_element_type=jnp.float32)
    acc = acc + b_ref[...]
    o_ref[...] = _maybe_gelu(acc, activation).astype(o_ref.dtype)


def _ln_qkv_kernel(x_ref, g_ref, bln_ref, w_ref, b_ref, q_ref, k_ref, v_ref,
                   *, eps):
    """Fused LayerNorm(x) @ W_qkv + b -> three (tm, E) head-minor outputs."""
    xn = _layernorm_f32(x_ref[...].astype(jnp.float32), g_ref, bln_ref, eps)
    acc = jnp.dot(xn.astype(w_ref.dtype), w_ref[...],
                  preferred_element_type=jnp.float32)
    acc = acc + b_ref[...]
    E = q_ref.shape[-1]                          # E is a multiple of 128 lanes
    q_ref[...] = acc[:, :E].astype(q_ref.dtype)
    k_ref[...] = acc[:, E:2 * E].astype(k_ref.dtype)
    v_ref[...] = acc[:, 2 * E:].astype(v_ref.dtype)


def _matmul_bias_res_kernel(x_ref, w_ref, b_ref, r_ref, o_ref):
    """Fused x @ w + b + residual (residual stream stays f32)."""
    x = x_ref[...].astype(w_ref.dtype)
    acc = jnp.dot(x, w_ref[...], preferred_element_type=jnp.float32)
    acc = acc + b_ref[...] + r_ref[...].astype(jnp.float32)
    o_ref[...] = acc.astype(o_ref.dtype)


def _attention_kernel(q_ref, k_ref, v_ref, o_ref, *, num_heads, scale):
    """One batch element, all heads.  Blocks are (1, S, E) in head-minor
    layout; heads are sliced in-VMEM (no HBM transposes in the wrapper)."""
    E = q_ref.shape[2]
    Dh = E // num_heads
    for h in range(num_heads):                   # static unroll over heads
        lo = h * Dh
        qh = q_ref[0, :, lo:lo + Dh]             # (S, Dh) bf16
        kh = k_ref[0, :, lo:lo + Dh]
        vh = v_ref[0, :, lo:lo + Dh]
        s = jax.lax.dot_general(qh, kh, (((1,), (1,)), ((), ())),
                                preferred_element_type=jnp.float32)
        s = s * jnp.float32(scale)
        s = s - jnp.max(s, axis=-1, keepdims=True)
        p = jnp.exp(s)
        p = p * pl.reciprocal(jnp.sum(p, axis=-1, keepdims=True), approx=True)
        oh = jnp.dot(p.astype(vh.dtype), vh, preferred_element_type=jnp.float32)
        o_ref[0, :, lo:lo + Dh] = oh.astype(o_ref.dtype)


# ---------------------------------------------------------------------------
# Pallas wrappers (all weights expected pre-transposed (K, N), bf16)
# ---------------------------------------------------------------------------
def linear_pallas(x, w, b, activation=None, out_dtype=None):
    """x: (M, K), w: (K, N) bf16, b: (N,) f32 -> (M, N)."""
    M, K = x.shape
    N = w.shape[1]
    out_dtype = out_dtype or x.dtype
    tm, tn = _row_tile(M), _col_tile(N)
    return pl.pallas_call(
        partial(_matmul_bias_kernel, activation=activation),
        out_shape=jax.ShapeDtypeStruct((M, N), out_dtype),
        grid=(pl.cdiv(N, tn), pl.cdiv(M, tm)),        # M innermost: weight
        in_specs=[                                    # block reused across i
            pl.BlockSpec((tm, K), lambda j, i: (i, 0)),
            pl.BlockSpec((K, tn), lambda j, i: (0, j)),
            pl.BlockSpec((1, tn), lambda j, i: (0, j)),
        ],
        out_specs=pl.BlockSpec((tm, tn), lambda j, i: (i, j)),
        compiler_params=_cparams(2),
    )(x, w, b.reshape(1, N))


def ln_linear_pallas(x, gamma, beta, w, b, activation=None, eps=1e-6,
                     out_dtype=None):
    """Fused LayerNorm + Linear: LN(x) @ w + b.  x: (M, K) f32."""
    M, K = x.shape
    N = w.shape[1]
    out_dtype = out_dtype or x.dtype
    tm, tn = _row_tile(M), _col_tile(N)
    return pl.pallas_call(
        partial(_ln_matmul_bias_kernel, eps=eps, activation=activation),
        out_shape=jax.ShapeDtypeStruct((M, N), out_dtype),
        grid=(pl.cdiv(N, tn), pl.cdiv(M, tm)),
        in_specs=[
            pl.BlockSpec((tm, K), lambda j, i: (i, 0)),
            pl.BlockSpec((1, K), lambda j, i: (0, 0)),
            pl.BlockSpec((1, K), lambda j, i: (0, 0)),
            pl.BlockSpec((K, tn), lambda j, i: (0, j)),
            pl.BlockSpec((1, tn), lambda j, i: (0, j)),
        ],
        out_specs=pl.BlockSpec((tm, tn), lambda j, i: (i, j)),
        compiler_params=_cparams(2),
    )(x, gamma.reshape(1, K), beta.reshape(1, K), w, b.reshape(1, N))


def ln_qkv_pallas(x, gamma, beta, w, b, eps=1e-6):
    """Fused LayerNorm + QKV projection.  x: (M, E) f32, w: (E, 3E) bf16.
    Returns q, k, v as three (M, E) bf16 arrays (head-minor layout)."""
    M, K = x.shape
    N3 = w.shape[1]
    E = N3 // 3
    tm = _row_tile(M)
    out_sds = jax.ShapeDtypeStruct((M, E), jnp.bfloat16)
    out_spec = pl.BlockSpec((tm, E), lambda i: (i, 0))
    return pl.pallas_call(
        partial(_ln_qkv_kernel, eps=eps),
        out_shape=(out_sds, out_sds, out_sds),
        grid=(pl.cdiv(M, tm),),
        in_specs=[
            pl.BlockSpec((tm, K), lambda i: (i, 0)),
            pl.BlockSpec((1, K), lambda i: (0, 0)),
            pl.BlockSpec((1, K), lambda i: (0, 0)),
            pl.BlockSpec((K, N3), lambda i: (0, 0)),
            pl.BlockSpec((1, N3), lambda i: (0, 0)),
        ],
        out_specs=(out_spec, out_spec, out_spec),
        compiler_params=_cparams(1),
    )(x, gamma.reshape(1, K), beta.reshape(1, K), w, b.reshape(1, N3))


def linear_residual_pallas(x, w, b, residual):
    """Fused Linear + residual add: x @ w + b + residual (f32 output)."""
    M, K = x.shape
    N = w.shape[1]
    tm, tn = _row_tile(M), _col_tile(N)
    return pl.pallas_call(
        _matmul_bias_res_kernel,
        out_shape=jax.ShapeDtypeStruct((M, N), residual.dtype),
        grid=(pl.cdiv(N, tn), pl.cdiv(M, tm)),
        in_specs=[
            pl.BlockSpec((tm, K), lambda j, i: (i, 0)),
            pl.BlockSpec((K, tn), lambda j, i: (0, j)),
            pl.BlockSpec((1, tn), lambda j, i: (0, j)),
            pl.BlockSpec((tm, tn), lambda j, i: (i, j)),
        ],
        out_specs=pl.BlockSpec((tm, tn), lambda j, i: (i, j)),
        compiler_params=_cparams(2),
    )(x, w, b.reshape(1, N), residual)


def attention_pallas(q, k, v, *, num_heads):
    """q, k, v: (B, S, E) bf16 head-minor -> (B, S, E) bf16; grid over batch."""
    B, S, E = q.shape
    scale = 1.0 / math.sqrt(E // num_heads)
    spec = pl.BlockSpec((1, S, E), lambda b: (b, 0, 0))
    return pl.pallas_call(
        partial(_attention_kernel, num_heads=num_heads, scale=scale),
        out_shape=jax.ShapeDtypeStruct((B, S, E), q.dtype),
        grid=(B,),
        in_specs=[spec, spec, spec],
        out_specs=spec,
        compiler_params=_cparams(1),
    )(q, k, v)


# ---------------------------------------------------------------------------
# Model glue (pure JAX views; all math happens in the kernels above)
# ---------------------------------------------------------------------------
def encoder_block(x, p, num_heads):
    B, S, E = x.shape
    x2 = x.reshape(B * S, E)                          # f32 residual stream

    # --- Multi-head self-attention (pre-LN), all fused / head-minor ---
    q, k, v = ln_qkv_pallas(x2, p["ln1_g"], p["ln1_b"], p["w_qkv"], p["b_qkv"])
    o = attention_pallas(q.reshape(B, S, E), k.reshape(B, S, E),
                         v.reshape(B, S, E), num_heads=num_heads)
    # out-proj + residual (dropout p=0.0 == identity), fused
    x2 = linear_residual_pallas(o.reshape(B * S, E), p["w_out"], p["b_out"], x2)

    # --- MLP (pre-LN): LN2 + Linear + GELU fused, then Linear + residual ---
    h = ln_linear_pallas(x2, p["ln2_g"], p["ln2_b"], p["w_mlp1"], p["b_mlp1"],
                         activation="gelu", out_dtype=jnp.bfloat16)
    x2 = linear_residual_pallas(h, p["w_mlp2"], p["b_mlp2"], x2)
    return x2.reshape(B, S, E)


def vit_linear_forward(params, x, *, patch_size, num_heads, n_classes):
    # x is NCHW (PyTorch convention).
    N, C, H, W = x.shape
    p = patch_size
    nh, nw = H // p, W // p
    E = params["class_token"].shape[-1]

    # Conv2d(kernel=p, stride=p) == im2col + matmul.  Flatten order (C, kh, kw)
    # matches the torch conv weight layout; w_patch is stored pre-flattened and
    # pre-transposed to (C*p*p, E) in bf16 at init.
    patches = (x.reshape(N, C, nh, p, nw, p)
                 .transpose(0, 2, 4, 1, 3, 5)
                 .reshape(N * nh * nw, C * p * p))
    tokens = linear_pallas(patches, params["w_patch"], params["b_patch"])
    tokens = tokens.reshape(N, nh * nw, E)

    cls = jnp.broadcast_to(params["class_token"], (N, 1, E))
    seq = jnp.concatenate([cls, tokens], axis=1) + params["pos_emb"]

    for lp in params["layers"]:
        seq = encoder_block(seq, lp, num_heads)

    # Final LayerNorm is row-wise, so LN(seq)[:, 0] == LN(seq[:, 0]); take the
    # CLS token first and fuse the final LN with the (lane-padded) classifier.
    cls_tok = seq[:, 0]                               # heads[0] = Identity
    logits = ln_linear_pallas(cls_tok, params["ln_g"], params["ln_b"],
                              params["w_head"], params["b_head"])
    return logits[:, :n_classes]


# ---------------------------------------------------------------------------
# Deterministic synthetic parameters.
# Weights are stored exactly as the kernels consume them: pre-transposed
# (K, N) layout, bf16.  (A real torch checkpoint maps as e.g.
#  w_qkv = in_proj_weight.T, w_out = out_proj.weight.T,
#  w_patch = conv_w.reshape(E, C*p*p).T, all cast to bf16.)
# ---------------------------------------------------------------------------
def init_params(key, *, image_size, patch_size, num_layers, num_heads,
                hidden_dim, mlp_dim, n_classes, channels=3):
    E, F = hidden_dim, mlp_dim
    seq_len = (image_size // patch_size) ** 2 + 1
    n_cls_pad = ((n_classes + 127) // 128) * 128      # lane-dense head output
    keys = iter(jax.random.split(key, 8 + 8 * num_layers))
    bf = jnp.bfloat16

    def nrm(shape, s=0.02, dtype=jnp.float32):
        return (s * jax.random.normal(next(keys), shape)).astype(dtype)

    w_head = jnp.zeros((E, n_cls_pad), bf).at[:, :n_classes].set(
        nrm((E, n_classes), dtype=bf))

    params = {
        "w_patch": nrm((channels * patch_size * patch_size, E), dtype=bf),
        "b_patch": jnp.zeros((E,), jnp.float32),
        "class_token": nrm((1, 1, E)),
        "pos_emb": nrm((1, seq_len, E)),
        "ln_g": jnp.ones((E,), jnp.float32),
        "ln_b": jnp.zeros((E,), jnp.float32),
        "w_head": w_head,
        "b_head": jnp.zeros((n_cls_pad,), jnp.float32),
        "layers": [],
    }
    for _ in range(num_layers):
        params["layers"].append({
            "ln1_g": jnp.ones((E,), jnp.float32),
            "ln1_b": jnp.zeros((E,), jnp.float32),
            "w_qkv": nrm((E, 3 * E), dtype=bf),
            "b_qkv": jnp.zeros((3 * E,), jnp.float32),
            "w_out": nrm((E, E), dtype=bf),
            "b_out": jnp.zeros((E,), jnp.float32),
            "ln2_g": jnp.ones((E,), jnp.float32),
            "ln2_b": jnp.zeros((E,), jnp.float32),
            "w_mlp1": nrm((E, F), dtype=bf),
            "b_mlp1": nrm((F,), 1e-6),
            "w_mlp2": nrm((F, E), dtype=bf),
            "b_mlp2": nrm((E,), 1e-6),
        })
    return params


# ---------------------------------------------------------------------------
if __name__ == "__main__":
    # Small config consistent with the module (full ViT-B/32 would be
    # image 224, patch 32, 12 layers, 12 heads, hidden 768, mlp 3072).
    IMAGE, PATCH = 64, 32
    LAYERS, HEADS, HIDDEN, MLP = 2, 4, 128, 256
    N_CLASSES, BATCH, CHANNELS = 16, 2, 3

    key = jax.random.PRNGKey(0)
    pkey, xkey = jax.random.split(key)
    params = init_params(pkey, image_size=IMAGE, patch_size=PATCH,
                         num_layers=LAYERS, num_heads=HEADS,
                         hidden_dim=HIDDEN, mlp_dim=MLP,
                         n_classes=N_CLASSES, channels=CHANNELS)
    x = jax.random.normal(xkey, (BATCH, CHANNELS, IMAGE, IMAGE), jnp.float32)

    fwd = jax.jit(partial(vit_linear_forward, patch_size=PATCH,
                          num_heads=HEADS, n_classes=N_CLASSES))
    y = fwd(params, x)
    jax.block_until_ready(y)
    assert y.shape == (BATCH, N_CLASSES) and y.dtype == jnp.float32
    print("KERNEL_OK")
</pallas_src>

<mosaic_0001>
module attributes {stable_mosaic.version = 11 : i64} {
  func.func @_matmul_bias_kernel(%arg0: i32, %arg1: i32, %arg2: memref<8x3072xf32, #tpu.memory_space<vmem>>, %arg3: memref<3072x128xbf16, #tpu.memory_space<vmem>>, %arg4: memref<1x128xf32, #tpu.memory_space<vmem>>, %arg5: memref<8x128xf32, #tpu.memory_space<vmem>>) attributes {dimension_semantics = [#tpu.dimension_semantics<parallel>, #tpu.dimension_semantics<parallel>], iteration_bounds = array<i64: 1, 1>, scalar_prefetch = 0 : i64, scratch_operands = 0 : i64, tpu.core_type = #tpu.core_type<tc>, window_params = [{transform_indices = @transform_0, window_bounds = array<i64: 8, 3072>}, {transform_indices = @transform_1, window_bounds = array<i64: 3072, 128>}, {transform_indices = @transform_2, window_bounds = array<i64: 1, 128>}, {transform_indices = @transform_3, window_bounds = array<i64: 8, 128>}]} {
    %c0 = arith.constant 0 : index
    %c0_0 = arith.constant 0 : index
    %0 = vector.load %arg2[%c0, %c0_0] : memref<8x3072xf32, #tpu.memory_space<vmem>>, vector<8x3072xf32>
    %1 = arith.truncf %0 : vector<8x3072xf32> to vector<8x3072xbf16>
    %c0_1 = arith.constant 0 : index
    %c0_2 = arith.constant 0 : index
    %2 = vector.load %arg3[%c0_1, %c0_2] : memref<3072x128xbf16, #tpu.memory_space<vmem>>, vector<3072x128xbf16>
    %cst = arith.constant dense<0.000000e+00> : vector<8x128xf32>
    %3 = tpu.matmul %1, %2, %cst {dimension_numbers = #tpu.dot_dimension_numbers<[1], [0], [0], [1], [0, 0, 1, 1], [], []>} : vector<8x3072xbf16>, vector<3072x128xbf16>, vector<8x128xf32> -> vector<8x128xf32>
    %c0_3 = arith.constant 0 : index
    %c0_4 = arith.constant 0 : index
    %4 = vector.load %arg4[%c0_3, %c0_4] : memref<1x128xf32, #tpu.memory_space<vmem>>, vector<1x128xf32>
    %5 = vector.broadcast %4 : vector<1x128xf32> to vector<8x128xf32>
    %6 = arith.addf %3, %5 : vector<8x128xf32>
    %c0_5 = arith.constant 0 : index
    %c0_6 = arith.constant 0 : index
    %7 = vector.load %arg5[%c0_5, %c0_6] : memref<8x128xf32, #tpu.memory_space<vmem>>, vector<8x128xf32>
    tpu.vector_store %arg5[%c0_5, %c0_6], %6 {strides = array<i32>} : memref<8x128xf32, #tpu.memory_space<vmem>>, vector<8x128xf32>,
    return
  }
  func.func @transform_0(%arg0: i32, %arg1: i32) -> (i32, i32) {
    %c0_i32 = arith.constant 0 : i32
    %c0_i32_0 = arith.constant 0 : i32
    return %arg1, %c0_i32 : i32, i32
  }
  func.func @transform_1(%arg0: i32, %arg1: i32) -> (i32, i32) {
    %c0_i32 = arith.constant 0 : i32
    %c0_i32_0 = arith.constant 0 : i32
    return %c0_i32, %arg0 : i32, i32
  }
  func.func @transform_2(%arg0: i32, %arg1: i32) -> (i32, i32) {
    %c0_i32 = arith.constant 0 : i32
    %c0_i32_0 = arith.constant 0 : i32
    return %c0_i32, %arg0 : i32, i32
  }
  func.func @transform_3(%arg0: i32, %arg1: i32) -> (i32, i32) {
    %c0_i32 = arith.constant 0 : i32
    return %arg1, %arg0 : i32, i32
  }
}

module attributes {stable_mosaic.version = 11 : i64} {
  func.func @_ln_qkv_kernel(%arg0: i32, %arg1: memref<10x128xf32, #tpu.memory_space<vmem>>, %arg2: memref<1x128xf32, #tpu.memory_space<vmem>>, %arg3: memref<1x128xf32, #tpu.memory_space<vmem>>, %arg4: memref<128x384xbf16, #tpu.memory_space<vmem>>, %arg5: memref<1x384xf32, #tpu.memory_space<vmem>>, %arg6: memref<10x128xbf16, #tpu.memory_space<vmem>>, %arg7: memref<10x128xbf16, #tpu.memory_space<vmem>>, %arg8: memref<10x128xbf16, #tpu.memory_space<vmem>>) attributes {dimension_semantics = [#tpu.dimension_semantics<parallel>], iteration_bounds = array<i64: 1>, scalar_prefetch = 0 : i64, scratch_operands = 0 : i64, tpu.core_type = #tpu.core_type<tc>, window_params = [{transform_indices = @transform_0, window_bounds = array<i64: 10, 128>}, {pipeline_mode = #tpu.pipeline_mode<synchronous>, transform_indices = @transform_1, window_bounds = array<i64: 1, 128>}, {pipeline_mode = #tpu.pipeline_mode<synchronous>, transform_indices = @transform_2, window_bounds = array<i64: 1, 128>}, {pipeline_mode = #tpu.pipeline_mode<synchronous>, transform_indices = @transform_3, window_bounds = array<i64: 128, 384>}, {pipeline_mode = #tpu.pipeline_mode<synchronous>, transform_indices = @transform_4, window_bounds = array<i64: 1, 384>}, {transform_indices = @transform_5, window_bounds = array<i64: 10, 128>}, {transform_indices = @transform_6, window_bounds = array<i64: 10, 128>}, {transform_indices = @transform_7, window_bounds = array<i64: 10, 128>}]} {
    %c0 = arith.constant 0 : index
    %c0_0 = arith.constant 0 : index
    %0 = vector.load %arg1[%c0, %c0_0] : memref<10x128xf32, #tpu.memory_space<vmem>>, vector<10x128xf32>
    %cst = arith.constant dense<0.000000e+00> : vector<10xf32>
    %1 = vector.multi_reduction <add>, %0, %cst [1] : vector<10x128xf32> to vector<10xf32>
    %2 = vector.shape_cast %1 : vector<10xf32> to vector<10x1xf32>
    %cst_1 = arith.constant 1.280000e+02 : f32
    %3 = vector.broadcast %cst_1 : f32 to vector<10x1xf32>
    %4 = arith.divf %2, %3 : vector<10x1xf32>
    %5 = vector.broadcast %4 : vector<10x1xf32> to vector<10x128xf32>
    %6 = arith.subf %0, %5 : vector<10x128xf32>
    %7 = arith.mulf %6, %6 : vector<10x128xf32>
    %cst_2 = arith.constant dense<0.000000e+00> : vector<10xf32>
    %8 = vector.multi_reduction <add>, %7, %cst_2 [1] : vector<10x128xf32> to vector<10xf32>
    %9 = vector.shape_cast %8 : vector<10xf32> to vector<10x1xf32>
    %cst_3 = arith.constant 1.280000e+02 : f32
    %10 = vector.broadcast %cst_3 : f32 to vector<10x1xf32>
    %11 = arith.divf %9, %10 : vector<10x1xf32>
    %12 = vector.broadcast %4 : vector<10x1xf32> to vector<10x128xf32>
    %13 = arith.subf %0, %12 : vector<10x128xf32>
    %cst_4 = arith.constant 9.99999997E-7 : f32
    %14 = vector.broadcast %cst_4 : f32 to vector<10x1xf32>
    %15 = arith.addf %11, %14 : vector<10x1xf32>
    %16 = math.rsqrt %15 : vector<10x1xf32>
    %17 = vector.broadcast %16 : vector<10x1xf32> to vector<10x128xf32>
    %18 = arith.mulf %13, %17 : vector<10x128xf32>
    %c0_5 = arith.constant 0 : index
    %c0_6 = arith.constant 0 : index
    %19 = vector.load %arg2[%c0_5, %c0_6] : memref<1x128xf32, #tpu.memory_space<vmem>>, vector<1x128xf32>
    %20 = vector.broadcast %19 : vector<1x128xf32> to vector<10x128xf32>
    %21 = arith.mulf %18, %20 : vector<10x128xf32>
    %c0_7 = arith.constant 0 : index
    %c0_8 = arith.constant 0 : index
    %22 = vector.load %arg3[%c0_7, %c0_8] : memref<1x128xf32, #tpu.memory_space<vmem>>, vector<1x128xf32>
    %23 = vector.broadcast %22 : vector<1x128xf32> to vector<10x128xf32>
    %24 = arith.addf %21, %23 : vector<10x128xf32>
    %25 = arith.truncf %24 : vector<10x128xf32> to vector<10x128xbf16>
    %c0_9 = arith.constant 0 : index
    %c0_10 = arith.constant 0 : index
    %26 = vector.load %arg4[%c0_9, %c0_10] : memref<128x384xbf16, #tpu.memory_space<vmem>>, vector<128x384xbf16>
    %cst_11 = arith.constant dense<0.000000e+00> : vector<10x384xf32>
    %27 = tpu.matmul %25, %26, %cst_11 {dimension_numbers = #tpu.dot_dimension_numbers<[1], [0], [0], [1], [0, 0, 1, 1], [], []>} : vector<10x128xbf16>, vector<128x384xbf16>, vector<10x384xf32> -> vector<10x384xf32>
    %c0_12 = arith.constant 0 : index
    %c0_13 = arith.constant 0 : index
    %28 = vector.load %arg5[%c0_12, %c0_13] : memref<1x384xf32, #tpu.memory_space<vmem>>, vector<1x384xf32>
    %29 = vector.broadcast %28 : vector<1x384xf32> to vector<10x384xf32>
    %30 = arith.addf %27, %29 : vector<10x384xf32>
    %31 = vector.extract_strided_slice %30 {offsets = [0, 0], sizes = [10, 128], strides = [1, 1]} : vector<10x384xf32> to vector<10x128xf32>
    %32 = arith.truncf %31 : vector<10x128xf32> to vector<10x128xbf16>
    %c0_14 = arith.constant 0 : index
    %c0_15 = arith.constant 0 : index
    %33 = vector.load %arg6[%c0_14, %c0_15] : memref<10x128xbf16, #tpu.memory_space<vmem>>, vector<10x128xbf16>
    tpu.vector_store %arg6[%c0_14, %c0_15], %32 {strides = array<i32>} : memref<10x128xbf16, #tpu.memory_space<vmem>>, vector<10x128xbf16>,
    %34 = vector.extract_strided_slice %30 {offsets = [0, 128], sizes = [10, 128], strides = [1, 1]} : vector<10x384xf32> to vector<10x128xf32>
    %35 = arith.truncf %34 : vector<10x128xf32> to vector<10x128xbf16>
    %c0_16 = arith.constant 0 : index
    %c0_17 = arith.constant 0 : index
    %36 = vector.load %arg7[%c0_16, %c0_17] : memref<10x128xbf16, #tpu.memory_space<vmem>>, vector<10x128xbf16>
    tpu.vector_store %arg7[%c0_16, %c0_17], %35 {strides = array<i32>} : memref<10x128xbf16, #tpu.memory_space<vmem>>, vector<10x128xbf16>,
    %37 = vector.extract_strided_slice %30 {offsets = [0, 256], sizes = [10, 128], strides = [1, 1]} : vector<10x384xf32> to vector<10x128xf32>
    %38 = arith.truncf %37 : vector<10x128xf32> to vector<10x128xbf16>
    %c0_18 = arith.constant 0 : index
    %c0_19 = arith.constant 0 : index
    %39 = vector.load %arg8[%c0_18, %c0_19] : memref<10x128xbf16, #tpu.memory_space<vmem>>, vector<10x128xbf16>
    tpu.vector_store %arg8[%c0_18, %c0_19], %38 {strides = array<i32>} : memref<10x128xbf16, #tpu.memory_space<vmem>>, vector<10x128xbf16>,
    return
  }
  func.func @transform_0(%arg0: i32) -> (i32, i32) {
    %c0_i32 = arith.constant 0 : i32
    %c0_i32_0 = arith.constant 0 : i32
    return %arg0, %c0_i32 : i32, i32
  }
  func.func @transform_1(%arg0: i32) -> (i32, i32) {
    %c0_i32 = arith.constant 0 : i32
    %c0_i32_0 = arith.constant 0 : i32
    %c0_i32_1 = arith.constant 0 : i32
    return %c0_i32, %c0_i32_0 : i32, i32
  }
  func.func @transform_2(%arg0: i32) -> (i32, i32) {
    %c0_i32 = arith.constant 0 : i32
    %c0_i32_0 = arith.constant 0 : i32
    %c0_i32_1 = arith.constant 0 : i32
    return %c0_i32, %c0_i32_0 : i32, i32
  }
  func.func @transform_3(%arg0: i32) -> (i32, i32) {
    %c0_i32 = arith.constant 0 : i32
    %c0_i32_0 = arith.constant 0 : i32
    %c0_i32_1 = arith.constant 0 : i32
    return %c0_i32, %c0_i32_0 : i32, i32
  }
  func.func @transform_4(%arg0: i32) -> (i32, i32) {
    %c0_i32 = arith.constant 0 : i32
    %c0_i32_0 = arith.constant 0 : i32
    %c0_i32_1 = arith.constant 0 : i32
    return %c0_i32, %c0_i32_0 : i32, i32
  }
  func.func @transform_5(%arg0: i32) -> (i32, i32) {
    %c0_i32 = arith.constant 0 : i32
    %c0_i32_0 = arith.constant 0 : i32
    return %arg0, %c0_i32 : i32, i32
  }
  func.func @transform_6(%arg0: i32) -> (i32, i32) {
    %c0_i32 = arith.constant 0 : i32
    %c0_i32_0 = arith.constant 0 : i32
    return %arg0, %c0_i32 : i32, i32
  }
  func.func @transform_7(%arg0: i32) -> (i32, i32) {
    %c0_i32 = arith.constant 0 : i32
    %c0_i32_0 = arith.constant 0 : i32
    return %arg0, %c0_i32 : i32, i32
  }
}

module attributes {stable_mosaic.version = 11 : i64} {
  func.func @_attention_kernel(%arg0: i32, %arg1: memref<1x5x128xbf16, #tpu.memory_space<vmem>>, %arg2: memref<1x5x128xbf16, #tpu.memory_space<vmem>>, %arg3: memref<1x5x128xbf16, #tpu.memory_space<vmem>>, %arg4: memref<1x5x128xbf16, #tpu.memory_space<vmem>>) attributes {dimension_semantics = [#tpu.dimension_semantics<parallel>], iteration_bounds = array<i64: 2>, scalar_prefetch = 0 : i64, scratch_operands = 0 : i64, tpu.core_type = #tpu.core_type<tc>, window_params = [{transform_indices = @transform_0, window_bounds = array<i64: 1, 5, 128>}, {transform_indices = @transform_1, window_bounds = array<i64: 1, 5, 128>}, {transform_indices = @transform_2, window_bounds = array<i64: 1, 5, 128>}, {transform_indices = @transform_3, window_bounds = array<i64: 1, 5, 128>}]} {
    %c0 = arith.constant 0 : index
    %c0_0 = arith.constant 0 : index
    %c0_1 = arith.constant 0 : index
    %0 = vector.load %arg1[%c0, %c0_0, %c0_1] : memref<1x5x128xbf16, #tpu.memory_space<vmem>>, vector<1x5x32xbf16>
    %1 = vector.shape_cast %0 : vector<1x5x32xbf16> to vector<5x32xbf16>
    %c0_2 = arith.constant 0 : index
    %c0_3 = arith.constant 0 : index
    %c0_4 = arith.constant 0 : index
    %2 = vector.load %arg2[%c0_2, %c0_3, %c0_4] : memref<1x5x128xbf16, #tpu.memory_space<vmem>>, vector<1x5x32xbf16>
    %3 = vector.shape_cast %2 : vector<1x5x32xbf16> to vector<5x32xbf16>
    %c0_5 = arith.constant 0 : index
    %c0_6 = arith.constant 0 : index
    %c0_7 = arith.constant 0 : index
    %4 = vector.load %arg3[%c0_5, %c0_6, %c0_7] : memref<1x5x128xbf16, #tpu.memory_space<vmem>>, vector<1x5x32xbf16>
    %5 = vector.shape_cast %4 : vector<1x5x32xbf16> to vector<5x32xbf16>
    %cst = arith.constant dense<0.000000e+00> : vector<5x5xf32>
    %6 = tpu.matmul %1, %3, %cst {dimension_numbers = #tpu.dot_dimension_numbers<[1], [1], [0], [0], [0, 0, 1, 0], [], []>} : vector<5x32xbf16>, vector<5x32xbf16>, vector<5x5xf32> -> vector<5x5xf32>
    %cst_8 = arith.constant 0.176776692 : f32
    %7 = vector.broadcast %cst_8 : f32 to vector<5x5xf32>
    %8 = arith.mulf %6, %7 : vector<5x5xf32>
    %cst_9 = arith.constant dense<0xFF800000> : vector<5xf32>
    %9 = vector.multi_reduction <maximumf>, %8, %cst_9 [1] : vector<5x5xf32> to vector<5xf32>
    %10 = vector.shape_cast %9 : vector<5xf32> to vector<5x1xf32>
    %11 = vector.broadcast %10 : vector<5x1xf32> to vector<5x5xf32>
    %12 = arith.subf %8, %11 : vector<5x5xf32>
    %13 = math.exp %12 : vector<5x5xf32>
    %cst_10 = arith.constant dense<0.000000e+00> : vector<5xf32>
    %14 = vector.multi_reduction <add>, %13, %cst_10 [1] : vector<5x5xf32> to vector<5xf32>
    %15 = vector.shape_cast %14 : vector<5xf32> to vector<5x1xf32>
    %16 = tpu.reciprocal %15 {approx = true} : vector<5x1xf32> -> vector<5x1xf32>
    %17 = vector.broadcast %16 : vector<5x1xf32> to vector<5x5xf32>
    %18 = arith.mulf %13, %17 : vector<5x5xf32>
    %19 = arith.truncf %18 : vector<5x5xf32> to vector<5x5xbf16>
    %cst_11 = arith.constant dense<0.000000e+00> : vector<5x32xf32>
    %20 = tpu.matmul %19, %5, %cst_11 {dimension_numbers = #tpu.dot_dimension_numbers<[1], [0], [0], [1], [0, 0, 1, 1], [], []>} : vector<5x5xbf16>, vector<5x32xbf16>, vector<5x32xf32> -> vector<5x32xf32>
    %21 = arith.truncf %20 : vector<5x32xf32> to vector<5x32xbf16>
    %c0_12 = arith.constant 0 : index
    %c0_13 = arith.constant 0 : index
    %c0_14 = arith.constant 0 : index
    %22 = vector.load %arg4[%c0_12, %c0_13, %c0_14] : memref<1x5x128xbf16, #tpu.memory_space<vmem>>, vector<1x5x32xbf16>
    %23 = vector.shape_cast %22 : vector<1x5x32xbf16> to vector<5x32xbf16>
    %24 = vector.shape_cast %21 : vector<5x32xbf16> to vector<1x5x32xbf16>
    tpu.vector_store %arg4[%c0_12, %c0_13, %c0_14], %24 {strides = array<i32>} : memref<1x5x128xbf16, #tpu.memory_space<vmem>>, vector<1x5x32xbf16>,
    %c0_15 = arith.constant 0 : index
    %c0_16 = arith.constant 0 : index
    %c32 = arith.constant 32 : index
    %25 = vector.load %arg1[%c0_15, %c0_16, %c32] : memref<1x5x128xbf16, #tpu.memory_space<vmem>>, vector<1x5x32xbf16>
    %26 = vector.shape_cast %25 : vector<1x5x32xbf16> to vector<5x32xbf16>
    %c0_17 = arith.constant 0 : index
    %c0_18 = arith.constant 0 : index
    %c32_19 = arith.constant 32 : index
    %27 = vector.load %arg2[%c0_17, %c0_18, %c32_19] : memref<1x5x128xbf16, #tpu.memory_space<vmem>>, vector<1x5x32xbf16>
    %28 = vector.shape_cast %27 : vector<1x5x32xbf16> to vector<5x32xbf16>
    %c0_20 = arith.constant 0 : index
    %c0_21 = arith.constant 0 : index
    %c32_22 = arith.constant 32 : index
    %29 = vector.load %arg3[%c0_20, %c0_21, %c32_22] : memref<1x5x128xbf16, #tpu.memory_space<vmem>>, vector<1x5x32xbf16>
    %30 = vector.shape_cast %29 : vector<1x5x32xbf16> to vector<5x32xbf16>
    %cst_23 = arith.constant dense<0.000000e+00> : vector<5x5xf32>
    %31 = tpu.matmul %26, %28, %cst_23 {dimension_numbers = #tpu.dot_dimension_numbers<[1], [1], [0], [0], [0, 0, 1, 0], [], []>} : vector<5x32xbf16>, vector<5x32xbf16>, vector<5x5xf32> -> vector<5x5xf32>
    %cst_24 = arith.constant 0.176776692 : f32
    %32 = vector.broadcast %cst_24 : f32 to vector<5x5xf32>
    %33 = arith.mulf %31, %32 : vector<5x5xf32>
    %cst_25 = arith.constant dense<0xFF800000> : vector<5xf32>
    %34 = vector.multi_reduction <maximumf>, %33, %cst_25 [1] : vector<5x5xf32> to vector<5xf32>
    %35 = vector.shape_cast %34 : vector<5xf32> to vector<5x1xf32>
    %36 = vector.broadcast %35 : vector<5x1xf32> to vector<5x5xf32>
    %37 = arith.subf %33, %36 : vector<5x5xf32>
    %38 = math.exp %37 : vector<5x5xf32>
    %cst_26 = arith.constant dense<0.000000e+00> : vector<5xf32>
    %39 = vector.multi_reduction <add>, %38, %cst_26 [1] : vector<5x5xf32> to vector<5xf32>
    %40 = vector.shape_cast %39 : vector<5xf32> to vector<5x1xf32>
    %41 = tpu.reciprocal %40 {approx = true} : vector<5x1xf32> -> vector<5x1xf32>
    %42 = vector.broadcast %41 : vector<5x1xf32> to vector<5x5xf32>
    %43 = arith.mulf %38, %42 : vector<5x5xf32>
    %44 = arith.truncf %43 : vector<5x5xf32> to vector<5x5xbf16>
    %cst_27 = arith.constant dense<0.000000e+00> : vector<5x32xf32>
    %45 = tpu.matmul %44, %30, %cst_27 {dimension_numbers = #tpu.dot_dimension_numbers<[1], [0], [0], [1], [0, 0, 1, 1], [], []>} : vector<5x5xbf16>, vector<5x32xbf16>, vector<5x32xf32> -> vector<5x32xf32>
    %46 = arith.truncf %45 : vector<5x32xf32> to vector<5x32xbf16>
    %c0_28 = arith.constant 0 : index
    %c0_29 = arith.constant 0 : index
    %c32_30 = arith.constant 32 : index
    %47 = vector.load %arg4[%c0_28, %c0_29, %c32_30] : memref<1x5x128xbf16, #tpu.memory_space<vmem>>, vector<1x5x32xbf16>
    %48 = vector.shape_cast %47 : vector<1x5x32xbf16> to vector<5x32xbf16>
    %49 = vector.shape_cast %46 : vector<5x32xbf16> to vector<1x5x32xbf16>
    tpu.vector_store %arg4[%c0_28, %c0_29, %c32_30], %49 {strides = array<i32>} : memref<1x5x128xbf16, #tpu.memory_space<vmem>>, vector<1x5x32xbf16>,
    %c0_31 = arith.constant 0 : index
    %c0_32 = arith.constant 0 : index
    %c64 = arith.constant 64 : index
    %50 = vector.load %arg1[%c0_31, %c0_32, %c64] : memref<1x5x128xbf16, #tpu.memory_space<vmem>>, vector<1x5x32xbf16>
    %51 = vector.shape_cast %50 : vector<1x5x32xbf16> to vector<5x32xbf16>
    %c0_33 = arith.constant 0 : index
    %c0_34 = arith.constant 0 : index
    %c64_35 = arith.constant 64 : index
    %52 = vector.load %arg2[%c0_33, %c0_34, %c64_35] : memref<1x5x128xbf16, #tpu.memory_space<vmem>>, vector<1x5x32xbf16>
    %53 = vector.shape_cast %52 : vector<1x5x32xbf16> to vector<5x32xbf16>
    %c0_36 = arith.constant 0 : index
    %c0_37 = arith.constant 0 : index
    %c64_38 = arith.constant 64 : index
    %54 = vector.load %arg3[%c0_36, %c0_37, %c64_38] : memref<1x5x128xbf16, #tpu.memory_space<vmem>>, vector<1x5x32xbf16>
    %55 = vector.shape_cast %54 : vector<1x5x32xbf16> to vector<5x32xbf16>
    %cst_39 = arith.constant dense<0.000000e+00> : vector<5x5xf32>
    %56 = tpu.matmul %51, %53, %cst_39 {dimension_numbers = #tpu.dot_dimension_numbers<[1], [1], [0], [0], [0, 0, 1, 0], [], []>} : vector<5x32xbf16>, vector<5x32xbf16>, vector<5x5xf32> -> vector<5x5xf32>
    %cst_40 = arith.constant 0.176776692 : f32
    %57 = vector.broadcast %cst_40 : f32 to vector<5x5xf32>
    %58 = arith.mulf %56, %57 : vector<5x5xf32>
    %cst_41 = arith.constant dense<0xFF800000> : vector<5xf32>
    %59 = vector.multi_reduction <maximumf>, %58, %cst_41 [1] : vector<5x5xf32> to vector<5xf32>
    %60 = vector.shape_cast %59 : vector<5xf32> to vector<5x1xf32>
    %61 = vector.broadcast %60 : vector<5x1xf32> to vector<5x5xf32>
    %62 = arith.subf %58, %61 : vector<5x5xf32>
    %63 = math.exp %62 : vector<5x5xf32>
    %cst_42 = arith.constant dense<0.000000e+00> : vector<5xf32>
    %64 = vector.multi_reduction <add>, %63, %cst_42 [1] : vector<5x5xf32> to vector<5xf32>
    %65 = vector.shape_cast %64 : vector<5xf32> to vector<5x1xf32>
    %66 = tpu.reciprocal %65 {approx = true} : vector<5x1xf32> -> vector<5x1xf32>
    %67 = vector.broadcast %66 : vector<5x1xf32> to vector<5x5xf32>
    %68 = arith.mulf %63, %67 : vector<5x5xf32>
    %69 = arith.truncf %68 : vector<5x5xf32> to vector<5x5xbf16>
    %cst_43 = arith.constant dense<0.000000e+00> : vector<5x32xf32>
    %70 = tpu.matmul %69, %55, %cst_43 {dimension_numbers = #tpu.dot_dimension_numbers<[1], [0], [0], [1], [0, 0, 1, 1], [], []>} : vector<5x5xbf16>, vector<5x32xbf16>, vector<5x32xf32> -> vector<5x32xf32>
    %71 = arith.truncf %70 : vector<5x32xf32> to vector<5x32xbf16>
    %c0_44 = arith.constant 0 : index
    %c0_45 = arith.constant 0 : index
    %c64_46 = arith.constant 64 : index
    %72 = vector.load %arg4[%c0_44, %c0_45, %c64_46] : memref<1x5x128xbf16, #tpu.memory_space<vmem>>, vector<1x5x32xbf16>
    %73 = vector.shape_cast %72 : vector<1x5x32xbf16> to vector<5x32xbf16>
    %74 = vector.shape_cast %71 : vector<5x32xbf16> to vector<1x5x32xbf16>
    tpu.vector_store %arg4[%c0_44, %c0_45, %c64_46], %74 {strides = array<i32>} : memref<1x5x128xbf16, #tpu.memory_space<vmem>>, vector<1x5x32xbf16>,
    %c0_47 = arith.constant 0 : index
    %c0_48 = arith.constant 0 : index
    %c96 = arith.constant 96 : index
    %75 = vector.load %arg1[%c0_47, %c0_48, %c96] : memref<1x5x128xbf16, #tpu.memory_space<vmem>>, vector<1x5x32xbf16>
    %76 = vector.shape_cast %75 : vector<1x5x32xbf16> to vector<5x32xbf16>
    %c0_49 = arith.constant 0 : index
    %c0_50 = arith.constant 0 : index
    %c96_51 = arith.constant 96 : index
    %77 = vector.load %arg2[%c0_49, %c0_50, %c96_51] : memref<1x5x128xbf16, #tpu.memory_space<vmem>>, vector<1x5x32xbf16>
    %78 = vector.shape_cast %77 : vector<1x5x32xbf16> to vector<5x32xbf16>
    %c0_52 = arith.constant 0 : index
    %c0_53 = arith.constant 0 : index
    %c96_54 = arith.constant 96 : index
    %79 = vector.load %arg3[%c0_52, %c0_53, %c96_54] : memref<1x5x128xbf16, #tpu.memory_space<vmem>>, vector<1x5x32xbf16>
    %80 = vector.shape_cast %79 : vector<1x5x32xbf16> to vector<5x32xbf16>
    %cst_55 = arith.constant dense<0.000000e+00> : vector<5x5xf32>
    %81 = tpu.matmul %76, %78, %cst_55 {dimension_numbers = #tpu.dot_dimension_numbers<[1], [1], [0], [0], [0, 0, 1, 0], [], []>} : vector<5x32xbf16>, vector<5x32xbf16>, vector<5x5xf32> -> vector<5x5xf32>
    %cst_56 = arith.constant 0.176776692 : f32
    %82 = vector.broadcast %cst_56 : f32 to vector<5x5xf32>
    %83 = arith.mulf %81, %82 : vector<5x5xf32>
    %cst_57 = arith.constant dense<0xFF800000> : vector<5xf32>
    %84 = vector.multi_reduction <maximumf>, %83, %cst_57 [1] : vector<5x5xf32> to vector<5xf32>
    %85 = vector.shape_cast %84 : vector<5xf32> to vector<5x1xf32>
    %86 = vector.broadcast %85 : vector<5x1xf32> to vector<5x5xf32>
    %87 = arith.subf %83, %86 : vector<5x5xf32>
    %88 = math.exp %87 : vector<5x5xf32>
    %cst_58 = arith.constant dense<0.000000e+00> : vector<5xf32>
    %89 = vector.multi_reduction <add>, %88, %cst_58 [1] : vector<5x5xf32> to vector<5xf32>
    %90 = vector.shape_cast %89 : vector<5xf32> to vector<5x1xf32>
    %91 = tpu.reciprocal %90 {approx = true} : vector<5x1xf32> -> vector<5x1xf32>
    %92 = vector.broadcast %91 : vector<5x1xf32> to vector<5x5xf32>
    %93 = arith.mulf %88, %92 : vector<5x5xf32>
    %94 = arith.truncf %93 : vector<5x5xf32> to vector<5x5xbf16>
    %cst_59 = arith.constant dense<0.000000e+00> : vector<5x32xf32>
    %95 = tpu.matmul %94, %80, %cst_59 {dimension_numbers = #tpu.dot_dimension_numbers<[1], [0], [0], [1], [0, 0, 1, 1], [], []>} : vector<5x5xbf16>, vector<5x32xbf16>, vector<5x32xf32> -> vector<5x32xf32>
    %96 = arith.truncf %95 : vector<5x32xf32> to vector<5x32xbf16>
    %c0_60 = arith.constant 0 : index
    %c0_61 = arith.constant 0 : index
    %c96_62 = arith.constant 96 : index
    %97 = vector.load %arg4[%c0_60, %c0_61, %c96_62] : memref<1x5x128xbf16, #tpu.memory_space<vmem>>, vector<1x5x32xbf16>
    %98 = vector.shape_cast %97 : vector<1x5x32xbf16> to vector<5x32xbf16>
    %99 = vector.shape_cast %96 : vector<5x32xbf16> to vector<1x5x32xbf16>
    tpu.vector_store %arg4[%c0_60, %c0_61, %c96_62], %99 {strides = array<i32>} : memref<1x5x128xbf16, #tpu.memory_space<vmem>>, vector<1x5x32xbf16>,
    return
  }
  func.func @transform_0(%arg0: i32) -> (i32, i32, i32) {
    %c0_i32 = arith.constant 0 : i32
    %c0_i32_0 = arith.constant 0 : i32
    %c0_i32_1 = arith.constant 0 : i32
    return %arg0, %c0_i32, %c0_i32_0 : i32, i32, i32
  }
  func.func @transform_1(%arg0: i32) -> (i32, i32, i32) {
    %c0_i32 = arith.constant 0 : i32
    %c0_i32_0 = arith.constant 0 : i32
    %c0_i32_1 = arith.constant 0 : i32
    return %arg0, %c0_i32, %c0_i32_0 : i32, i32, i32
  }
  func.func @transform_2(%arg0: i32) -> (i32, i32, i32) {
    %c0_i32 = arith.constant 0 : i32
    %c0_i32_0 = arith.constant 0 : i32
    %c0_i32_1 = arith.constant 0 : i32
    return %arg0, %c0_i32, %c0_i32_0 : i32, i32, i32
  }
  func.func @transform_3(%arg0: i32) -> (i32, i32, i32) {
    %c0_i32 = arith.constant 0 : i32
    %c0_i32_0 = arith.constant 0 : i32
    %c0_i32_1 = arith.constant 0 : i32
    return %arg0, %c0_i32, %c0_i32_0 : i32, i32, i32
  }
}

module attributes {stable_mosaic.version = 11 : i64} {
  func.func @_matmul_bias_res_kernel(%arg0: i32, %arg1: i32, %arg2: memref<10x128xbf16, #tpu.memory_space<vmem>>, %arg3: memref<128x128xbf16, #tpu.memory_space<vmem>>, %arg4: memref<1x128xf32, #tpu.memory_space<vmem>>, %arg5: memref<10x128xf32, #tpu.memory_space<vmem>>, %arg6: memref<10x128xf32, #tpu.memory_space<vmem>>) attributes {dimension_semantics = [#tpu.dimension_semantics<parallel>, #tpu.dimension_semantics<parallel>], iteration_bounds = array<i64: 1, 1>, scalar_prefetch = 0 : i64, scratch_operands = 0 : i64, tpu.core_type = #tpu.core_type<tc>, window_params = [{transform_indices = @transform_0, window_bounds = array<i64: 10, 128>}, {transform_indices = @transform_1, window_bounds = array<i64: 128, 128>}, {transform_indices = @transform_2, window_bounds = array<i64: 1, 128>}, {transform_indices = @transform_3, window_bounds = array<i64: 10, 128>}, {transform_indices = @transform_4, window_bounds = array<i64: 10, 128>}]} {
    %c0 = arith.constant 0 : index
    %c0_0 = arith.constant 0 : index
    %0 = vector.load %arg2[%c0, %c0_0] : memref<10x128xbf16, #tpu.memory_space<vmem>>, vector<10x128xbf16>
    %c0_1 = arith.constant 0 : index
    %c0_2 = arith.constant 0 : index
    %1 = vector.load %arg3[%c0_1, %c0_2] : memref<128x128xbf16, #tpu.memory_space<vmem>>, vector<128x128xbf16>
    %cst = arith.constant dense<0.000000e+00> : vector<10x128xf32>
    %2 = tpu.matmul %0, %1, %cst {dimension_numbers = #tpu.dot_dimension_numbers<[1], [0], [0], [1], [0, 0, 1, 1], [], []>} : vector<10x128xbf16>, vector<128x128xbf16>, vector<10x128xf32> -> vector<10x128xf32>
    %c0_3 = arith.constant 0 : index
    %c0_4 = arith.constant 0 : index
    %3 = vector.load %arg4[%c0_3, %c0_4] : memref<1x128xf32, #tpu.memory_space<vmem>>, vector<1x128xf32>
    %4 = vector.broadcast %3 : vector<1x128xf32> to vector<10x128xf32>
    %5 = arith.addf %2, %4 : vector<10x128xf32>
    %c0_5 = arith.constant 0 : index
    %c0_6 = arith.constant 0 : index
    %6 = vector.load %arg5[%c0_5, %c0_6] : memref<10x128xf32, #tpu.memory_space<vmem>>, vector<10x128xf32>
    %7 = arith.addf %5, %6 : vector<10x128xf32>
    %c0_7 = arith.constant 0 : index
    %c0_8 = arith.constant 0 : index
    %8 = vector.load %arg6[%c0_7, %c0_8] : memref<10x128xf32, #tpu.memory_space<vmem>>, vector<10x128xf32>
    tpu.vector_store %arg6[%c0_7, %c0_8], %7 {strides = array<i32>} : memref<10x128xf32, #tpu.memory_space<vmem>>, vector<10x128xf32>,
    return
  }
  func.func @transform_0(%arg0: i32, %arg1: i32) -> (i32, i32) {
    %c0_i32 = arith.constant 0 : i32
    %c0_i32_0 = arith.constant 0 : i32
    return %arg1, %c0_i32 : i32, i32
  }
  func.func @transform_1(%arg0: i32, %arg1: i32) -> (i32, i32) {
    %c0_i32 = arith.constant 0 : i32
    %c0_i32_0 = arith.constant 0 : i32
    return %c0_i32, %arg0 : i32, i32
  }
  func.func @transform_2(%arg0: i32, %arg1: i32) -> (i32, i32) {
    %c0_i32 = arith.constant 0 : i32
    %c0_i32_0 = arith.constant 0 : i32
    return %c0_i32, %arg0 : i32, i32
  }
  func.func @transform_3(%arg0: i32, %arg1: i32) -> (i32, i32) {
    %c0_i32 = arith.constant 0 : i32
    return %arg1, %arg0 : i32, i32
  }
  func.func @transform_4(%arg0: i32, %arg1: i32) -> (i32, i32) {
    %c0_i32 = arith.constant 0 : i32
    return %arg1, %arg0 : i32, i32
  }
}

module attributes {stable_mosaic.version = 11 : i64} {
  func.func @_ln_matmul_bias_kernel(%arg0: i32, %arg1: i32, %arg2: memref<10x128xf32, #tpu.memory_space<vmem>>, %arg3: memref<1x128xf32, #tpu.memory_space<vmem>>, %arg4: memref<1x128xf32, #tpu.memory_space<vmem>>, %arg5: memref<128x256xbf16, #tpu.memory_space<vmem>>, %arg6: memref<1x256xf32, #tpu.memory_space<vmem>>, %arg7: memref<10x256xbf16, #tpu.memory_space<vmem>>) attributes {dimension_semantics = [#tpu.dimension_semantics<parallel>, #tpu.dimension_semantics<parallel>], iteration_bounds = array<i64: 1, 1>, scalar_prefetch = 0 : i64, scratch_operands = 0 : i64, tpu.core_type = #tpu.core_type<tc>, window_params = [{transform_indices = @transform_0, window_bounds = array<i64: 10, 128>}, {pipeline_mode = #tpu.pipeline_mode<synchronous>, transform_indices = @transform_1, window_bounds = array<i64: 1, 128>}, {pipeline_mode = #tpu.pipeline_mode<synchronous>, transform_indices = @transform_2, window_bounds = array<i64: 1, 128>}, {transform_indices = @transform_3, window_bounds = array<i64: 128, 256>}, {transform_indices = @transform_4, window_bounds = array<i64: 1, 256>}, {transform_indices = @transform_5, window_bounds = array<i64: 10, 256>}]} {
    %c0 = arith.constant 0 : index
    %c0_0 = arith.constant 0 : index
    %0 = vector.load %arg2[%c0, %c0_0] : memref<10x128xf32, #tpu.memory_space<vmem>>, vector<10x128xf32>
    %cst = arith.constant dense<0.000000e+00> : vector<10xf32>
    %1 = vector.multi_reduction <add>, %0, %cst [1] : vector<10x128xf32> to vector<10xf32>
    %2 = vector.shape_cast %1 : vector<10xf32> to vector<10x1xf32>
    %cst_1 = arith.constant 1.280000e+02 : f32
    %3 = vector.broadcast %cst_1 : f32 to vector<10x1xf32>
    %4 = arith.divf %2, %3 : vector<10x1xf32>
    %5 = vector.broadcast %4 : vector<10x1xf32> to vector<10x128xf32>
    %6 = arith.subf %0, %5 : vector<10x128xf32>
    %7 = arith.mulf %6, %6 : vector<10x128xf32>
    %cst_2 = arith.constant dense<0.000000e+00> : vector<10xf32>
    %8 = vector.multi_reduction <add>, %7, %cst_2 [1] : vector<10x128xf32> to vector<10xf32>
    %9 = vector.shape_cast %8 : vector<10xf32> to vector<10x1xf32>
    %cst_3 = arith.constant 1.280000e+02 : f32
    %10 = vector.broadcast %cst_3 : f32 to vector<10x1xf32>
    %11 = arith.divf %9, %10 : vector<10x1xf32>
    %12 = vector.broadcast %4 : vector<10x1xf32> to vector<10x128xf32>
    %13 = arith.subf %0, %12 : vector<10x128xf32>
    %cst_4 = arith.constant 9.99999997E-7 : f32
    %14 = vector.broadcast %cst_4 : f32 to vector<10x1xf32>
    %15 = arith.addf %11, %14 : vector<10x1xf32>
    %16 = math.rsqrt %15 : vector<10x1xf32>
    %17 = vector.broadcast %16 : vector<10x1xf32> to vector<10x128xf32>
    %18 = arith.mulf %13, %17 : vector<10x128xf32>
    %c0_5 = arith.constant 0 : index
    %c0_6 = arith.constant 0 : index
    %19 = vector.load %arg3[%c0_5, %c0_6] : memref<1x128xf32, #tpu.memory_space<vmem>>, vector<1x128xf32>
    %20 = vector.broadcast %19 : vector<1x128xf32> to vector<10x128xf32>
    %21 = arith.mulf %18, %20 : vector<10x128xf32>
    %c0_7 = arith.constant 0 : index
    %c0_8 = arith.constant 0 : index
    %22 = vector.load %arg4[%c0_7, %c0_8] : memref<1x128xf32, #tpu.memory_space<vmem>>, vector<1x128xf32>
    %23 = vector.broadcast %22 : vector<1x128xf32> to vector<10x128xf32>
    %24 = arith.addf %21, %23 : vector<10x128xf32>
    %25 = arith.truncf %24 : vector<10x128xf32> to vector<10x128xbf16>
    %c0_9 = arith.constant 0 : index
    %c0_10 = arith.constant 0 : index
    %26 = vector.load %arg5[%c0_9, %c0_10] : memref<128x256xbf16, #tpu.memory_space<vmem>>, vector<128x256xbf16>
    %cst_11 = arith.constant dense<0.000000e+00> : vector<10x256xf32>
    %27 = tpu.matmul %25, %26, %cst_11 {dimension_numbers = #tpu.dot_dimension_numbers<[1], [0], [0], [1], [0, 0, 1, 1], [], []>} : vector<10x128xbf16>, vector<128x256xbf16>, vector<10x256xf32> -> vector<10x256xf32>
    %c0_12 = arith.constant 0 : index
    %c0_13 = arith.constant 0 : index
    %28 = vector.load %arg6[%c0_12, %c0_13] : memref<1x256xf32, #tpu.memory_space<vmem>>, vector<1x256xf32>
    %29 = vector.broadcast %28 : vector<1x256xf32> to vector<10x256xf32>
    %30 = arith.addf %27, %29 : vector<10x256xf32>
    %cst_14 = arith.constant 5.000000e-01 : f32
    %31 = vector.broadcast %cst_14 : f32 to vector<10x256xf32>
    %32 = arith.mulf %31, %30 : vector<10x256xf32>
    %cst_15 = arith.constant 0.707106769 : f32
    %33 = vector.broadcast %cst_15 : f32 to vector<10x256xf32>
    %34 = arith.mulf %30, %33 : vector<10x256xf32>
    %35 = math.erf %34 : vector<10x256xf32>
    %cst_16 = arith.constant 1.000000e+00 : f32
    %36 = vector.broadcast %cst_16 : f32 to vector<10x256xf32>
    %37 = arith.addf %36, %35 : vector<10x256xf32>
    %38 = arith.mulf %32, %37 : vector<10x256xf32>
    %39 = arith.truncf %38 : vector<10x256xf32> to vector<10x256xbf16>
    %c0_17 = arith.constant 0 : index
    %c0_18 = arith.constant 0 : index
    %40 = vector.load %arg7[%c0_17, %c0_18] : memref<10x256xbf16, #tpu.memory_space<vmem>>, vector<10x256xbf16>
    tpu.vector_store %arg7[%c0_17, %c0_18], %39 {strides = array<i32>} : memref<10x256xbf16, #tpu.memory_space<vmem>>, vector<10x256xbf16>,
    return
  }
  func.func @transform_0(%arg0: i32, %arg1: i32) -> (i32, i32) {
    %c0_i32 = arith.constant 0 : i32
    %c0_i32_0 = arith.constant 0 : i32
    return %arg1, %c0_i32 : i32, i32
  }
  func.func @transform_1(%arg0: i32, %arg1: i32) -> (i32, i32) {
    %c0_i32 = arith.constant 0 : i32
    %c0_i32_0 = arith.constant 0 : i32
    %c0_i32_1 = arith.constant 0 : i32
    return %c0_i32, %c0_i32_0 : i32, i32
  }
  func.func @transform_2(%arg0: i32, %arg1: i32) -> (i32, i32) {
    %c0_i32 = arith.constant 0 : i32
    %c0_i32_0 = arith.constant 0 : i32
    %c0_i32_1 = arith.constant 0 : i32
    return %c0_i32, %c0_i32_0 : i32, i32
  }
  func.func @transform_3(%arg0: i32, %arg1: i32) -> (i32, i32) {
    %c0_i32 = arith.constant 0 : i32
    %c0_i32_0 = arith.constant 0 : i32
    return %c0_i32, %arg0 : i32, i32
  }
  func.func @transform_4(%arg0: i32, %arg1: i32) -> (i32, i32) {
    %c0_i32 = arith.constant 0 : i32
    %c0_i32_0 = arith.constant 0 : i32
    return %c0_i32, %arg0 : i32, i32
  }
  func.func @transform_5(%arg0: i32, %arg1: i32) -> (i32, i32) {
    %c0_i32 = arith.constant 0 : i32
    return %arg1, %arg0 : i32, i32
  }
}

module attributes {stable_mosaic.version = 11 : i64} {
  func.func @_matmul_bias_res_kernel(%arg0: i32, %arg1: i32, %arg2: memref<10x256xbf16, #tpu.memory_space<vmem>>, %arg3: memref<256x128xbf16, #tpu.memory_space<vmem>>, %arg4: memref<1x128xf32, #tpu.memory_space<vmem>>, %arg5: memref<10x128xf32, #tpu.memory_space<vmem>>, %arg6: memref<10x128xf32, #tpu.memory_space<vmem>>) attributes {dimension_semantics = [#tpu.dimension_semantics<parallel>, #tpu.dimension_semantics<parallel>], iteration_bounds = array<i64: 1, 1>, scalar_prefetch = 0 : i64, scratch_operands = 0 : i64, tpu.core_type = #tpu.core_type<tc>, window_params = [{transform_indices = @transform_0, window_bounds = array<i64: 10, 256>}, {transform_indices = @transform_1, window_bounds = array<i64: 256, 128>}, {transform_indices = @transform_2, window_bounds = array<i64: 1, 128>}, {transform_indices = @transform_3, window_bounds = array<i64: 10, 128>}, {transform_indices = @transform_4, window_bounds = array<i64: 10, 128>}]} {
    %c0 = arith.constant 0 : index
    %c0_0 = arith.constant 0 : index
    %0 = vector.load %arg2[%c0, %c0_0] : memref<10x256xbf16, #tpu.memory_space<vmem>>, vector<10x256xbf16>
    %c0_1 = arith.constant 0 : index
    %c0_2 = arith.constant 0 : index
    %1 = vector.load %arg3[%c0_1, %c0_2] : memref<256x128xbf16, #tpu.memory_space<vmem>>, vector<256x128xbf16>
    %cst = arith.constant dense<0.000000e+00> : vector<10x128xf32>
    %2 = tpu.matmul %0, %1, %cst {dimension_numbers = #tpu.dot_dimension_numbers<[1], [0], [0], [1], [0, 0, 1, 1], [], []>} : vector<10x256xbf16>, vector<256x128xbf16>, vector<10x128xf32> -> vector<10x128xf32>
    %c0_3 = arith.constant 0 : index
    %c0_4 = arith.constant 0 : index
    %3 = vector.load %arg4[%c0_3, %c0_4] : memref<1x128xf32, #tpu.memory_space<vmem>>, vector<1x128xf32>
    %4 = vector.broadcast %3 : vector<1x128xf32> to vector<10x128xf32>
    %5 = arith.addf %2, %4 : vector<10x128xf32>
    %c0_5 = arith.constant 0 : index
    %c0_6 = arith.constant 0 : index
    %6 = vector.load %arg5[%c0_5, %c0_6] : memref<10x128xf32, #tpu.memory_space<vmem>>, vector<10x128xf32>
    %7 = arith.addf %5, %6 : vector<10x128xf32>
    %c0_7 = arith.constant 0 : index
    %c0_8 = arith.constant 0 : index
    %8 = vector.load %arg6[%c0_7, %c0_8] : memref<10x128xf32, #tpu.memory_space<vmem>>, vector<10x128xf32>
    tpu.vector_store %arg6[%c0_7, %c0_8], %7 {strides = array<i32>} : memref<10x128xf32, #tpu.memory_space<vmem>>, vector<10x128xf32>,
    return
  }
  func.func @transform_0(%arg0: i32, %arg1: i32) -> (i32, i32) {
    %c0_i32 = arith.constant 0 : i32
    %c0_i32_0 = arith.constant 0 : i32
    return %arg1, %c0_i32 : i32, i32
  }
  func.func @transform_1(%arg0: i32, %arg1: i32) -> (i32, i32) {
    %c0_i32 = arith.constant 0 : i32
    %c0_i32_0 = arith.constant 0 : i32
    return %c0_i32, %arg0 : i32, i32
  }
  func.func @transform_2(%arg0: i32, %arg1: i32) -> (i32, i32) {
    %c0_i32 = arith.constant 0 : i32
    %c0_i32_0 = arith.constant 0 : i32
    return %c0_i32, %arg0 : i32, i32
  }
  func.func @transform_3(%arg0: i32, %arg1: i32) -> (i32, i32) {
    %c0_i32 = arith.constant 0 : i32
    return %arg1, %arg0 : i32, i32
  }
  func.func @transform_4(%arg0: i32, %arg1: i32) -> (i32, i32) {
    %c0_i32 = arith.constant 0 : i32
    return %arg1, %arg0 : i32, i32
  }
}

module attributes {stable_mosaic.version = 11 : i64} {
  func.func @_ln_matmul_bias_kernel(%arg0: i32, %arg1: i32, %arg2: memref<2x128xf32, #tpu.memory_space<vmem>>, %arg3: memref<1x128xf32, #tpu.memory_space<vmem>>, %arg4: memref<1x128xf32, #tpu.memory_space<vmem>>, %arg5: memref<128x128xbf16, #tpu.memory_space<vmem>>, %arg6: memref<1x128xf32, #tpu.memory_space<vmem>>, %arg7: memref<2x128xf32, #tpu.memory_space<vmem>>) attributes {dimension_semantics = [#tpu.dimension_semantics<parallel>, #tpu.dimension_semantics<parallel>], iteration_bounds = array<i64: 1, 1>, scalar_prefetch = 0 : i64, scratch_operands = 0 : i64, tpu.core_type = #tpu.core_type<tc>, window_params = [{transform_indices = @transform_0, window_bounds = array<i64: 2, 128>}, {pipeline_mode = #tpu.pipeline_mode<synchronous>, transform_indices = @transform_1, window_bounds = array<i64: 1, 128>}, {pipeline_mode = #tpu.pipeline_mode<synchronous>, transform_indices = @transform_2, window_bounds = array<i64: 1, 128>}, {transform_indices = @transform_3, window_bounds = array<i64: 128, 128>}, {transform_indices = @transform_4, window_bounds = array<i64: 1, 128>}, {transform_indices = @transform_5, window_bounds = array<i64: 2, 128>}]} {
    %c0 = arith.constant 0 : index
    %c0_0 = arith.constant 0 : index
    %0 = vector.load %arg2[%c0, %c0_0] : memref<2x128xf32, #tpu.memory_space<vmem>>, vector<2x128xf32>
    %cst = arith.constant dense<0.000000e+00> : vector<2xf32>
    %1 = vector.multi_reduction <add>, %0, %cst [1] : vector<2x128xf32> to vector<2xf32>
    %2 = vector.shape_cast %1 : vector<2xf32> to vector<2x1xf32>
    %cst_1 = arith.constant 1.280000e+02 : f32
    %3 = vector.broadcast %cst_1 : f32 to vector<2x1xf32>
    %4 = arith.divf %2, %3 : vector<2x1xf32>
    %5 = vector.broadcast %4 : vector<2x1xf32> to vector<2x128xf32>
    %6 = arith.subf %0, %5 : vector<2x128xf32>
    %7 = arith.mulf %6, %6 : vector<2x128xf32>
    %cst_2 = arith.constant dense<0.000000e+00> : vector<2xf32>
    %8 = vector.multi_reduction <add>, %7, %cst_2 [1] : vector<2x128xf32> to vector<2xf32>
    %9 = vector.shape_cast %8 : vector<2xf32> to vector<2x1xf32>
    %cst_3 = arith.constant 1.280000e+02 : f32
    %10 = vector.broadcast %cst_3 : f32 to vector<2x1xf32>
    %11 = arith.divf %9, %10 : vector<2x1xf32>
    %12 = vector.broadcast %4 : vector<2x1xf32> to vector<2x128xf32>
    %13 = arith.subf %0, %12 : vector<2x128xf32>
    %cst_4 = arith.constant 9.99999997E-7 : f32
    %14 = vector.broadcast %cst_4 : f32 to vector<2x1xf32>
    %15 = arith.addf %11, %14 : vector<2x1xf32>
    %16 = math.rsqrt %15 : vector<2x1xf32>
    %17 = vector.broadcast %16 : vector<2x1xf32> to vector<2x128xf32>
    %18 = arith.mulf %13, %17 : vector<2x128xf32>
    %c0_5 = arith.constant 0 : index
    %c0_6 = arith.constant 0 : index
    %19 = vector.load %arg3[%c0_5, %c0_6] : memref<1x128xf32, #tpu.memory_space<vmem>>, vector<1x128xf32>
    %20 = vector.broadcast %19 : vector<1x128xf32> to vector<2x128xf32>
    %21 = arith.mulf %18, %20 : vector<2x128xf32>
    %c0_7 = arith.constant 0 : index
    %c0_8 = arith.constant 0 : index
    %22 = vector.load %arg4[%c0_7, %c0_8] : memref<1x128xf32, #tpu.memory_space<vmem>>, vector<1x128xf32>
    %23 = vector.broadcast %22 : vector<1x128xf32> to vector<2x128xf32>
    %24 = arith.addf %21, %23 : vector<2x128xf32>
    %25 = arith.truncf %24 : vector<2x128xf32> to vector<2x128xbf16>
    %c0_9 = arith.constant 0 : index
    %c0_10 = arith.constant 0 : index
    %26 = vector.load %arg5[%c0_9, %c0_10] : memref<128x128xbf16, #tpu.memory_space<vmem>>, vector<128x128xbf16>
    %cst_11 = arith.constant dense<0.000000e+00> : vector<2x128xf32>
    %27 = tpu.matmul %25, %26, %cst_11 {dimension_numbers = #tpu.dot_dimension_numbers<[1], [0], [0], [1], [0, 0, 1, 1], [], []>} : vector<2x128xbf16>, vector<128x128xbf16>, vector<2x128xf32> -> vector<2x128xf32>
    %c0_12 = arith.constant 0 : index
    %c0_13 = arith.constant 0 : index
    %28 = vector.load %arg6[%c0_12, %c0_13] : memref<1x128xf32, #tpu.memory_space<vmem>>, vector<1x128xf32>
    %29 = vector.broadcast %28 : vector<1x128xf32> to vector<2x128xf32>
    %30 = arith.addf %27, %29 : vector<2x128xf32>
    %c0_14 = arith.constant 0 : index
    %c0_15 = arith.constant 0 : index
    %31 = vector.load %arg7[%c0_14, %c0_15] : memref<2x128xf32, #tpu.memory_space<vmem>>, vector<2x128xf32>
    tpu.vector_store %arg7[%c0_14, %c0_15], %30 {strides = array<i32>} : memref<2x128xf32, #tpu.memory_space<vmem>>, vector<2x128xf32>,
    return
  }
  func.func @transform_0(%arg0: i32, %arg1: i32) -> (i32, i32) {
    %c0_i32 = arith.constant 0 : i32
    %c0_i32_0 = arith.constant 0 : i32
    return %arg1, %c0_i32 : i32, i32
  }
  func.func @transform_1(%arg0: i32, %arg1: i32) -> (i32, i32) {
    %c0_i32 = arith.constant 0 : i32
    %c0_i32_0 = arith.constant 0 : i32
    %c0_i32_1 = arith.constant 0 : i32
    return %c0_i32, %c0_i32_0 : i32, i32
  }
  func.func @transform_2(%arg0: i32, %arg1: i32) -> (i32, i32) {
    %c0_i32 = arith.constant 0 : i32
    %c0_i32_0 = arith.constant 0 : i32
    %c0_i32_1 = arith.constant 0 : i32
    return %c0_i32, %c0_i32_0 : i32, i32
  }
  func.func @transform_3(%arg0: i32, %arg1: i32) -> (i32, i32) {
    %c0_i32 = arith.constant 0 : i32
    %c0_i32_0 = arith.constant 0 : i32
    return %c0_i32, %arg0 : i32, i32
  }
  func.func @transform_4(%arg0: i32, %arg1: i32) -> (i32, i32) {
    %c0_i32 = arith.constant 0 : i32
    %c0_i32_0 = arith.constant 0 : i32
    return %c0_i32, %arg0 : i32, i32
  }
  func.func @transform_5(%arg0: i32, %arg1: i32) -> (i32, i32) {
    %c0_i32 = arith.constant 0 : i32
    return %arg1, %arg0 : i32, i32
  }
}

</mosaic_0001>

<bundles_post_ra>
// kernel: vit_linear_forward.13
= control target key start
LH: loop header
LB: loop body
LE: loop exit
PB: predicated region body
PF: predicated region fallthrough
CT: control target
= control target key end

     0   :  { %vm28_vm0 = vcmask 1041408   ;;  %v480_v4 = vmov 0.0   ;;  %v481_v32 = vmov 0   ;;  %vm482_vm1 = vmmov 0   ;;  %s649_s0 = inlined_call_operand.vmem [shape: f32[10,128], index: 0, kind: input, shape index: {}]   ;;  %s650_s3 = inlined_call_operand.vmem [shape: bf16[128,384], index: 3, kind: input, shape index: {}]   ;;  %s651_s1 = inlined_call_operand.vmem [shape: f32[1,128], index: 1, kind: input, shape index: {}]   ;;  %s652_s2 = inlined_call_operand.vmem [shape: f32[1,128], index: 2, kind: input, shape index: {}]   ;;  %s653_s4 = inlined_call_operand.vmem [shape: f32[1,384], index: 4, kind: input, shape index: {}]   ;;  %s654_s5 = inlined_call_operand.vmem [shape: bf16[10,128], index: 5, kind: output, shape index: {0}]   ;;  %s655_s7 = inlined_call_operand.vmem [shape: bf16[10,128], index: 7, kind: output, shape index: {2}]   ;;  %s656_s6 = inlined_call_operand.vmem [shape: bf16[10,128], index: 6, kind: output, shape index: {1}]  }
   0x1   :  { %v25_v0 = vld [vmem:[%s649_s0 + $0x8] sm:$0x3]  ;;  %v24_v2 = vld [vmem:[%s649_s0] sm:$0xff]  ;;  %421 = vmatprep.subr.bf16.mxu1 %v480_v4  ;;  %v454_v20 = vld [vmem:[%s650_s3 + $0x30] ss:$12 sps:$4 sm:$0xff]   ;;  %280 = vmatprep.mubr.bf16.mxu0 %v481_v32  ;;  %v105_v55 = vlaneseq }
   0x2   :  { %v29_v1 = vsel %vm28_vm0, %v25_v0, 0.0  ;;  %v444_v3 = vld [vmem:[%s650_s3 + $0x4] ss:$12 sps:$4 sm:$0xff]   ;;  %v446_v5 = vld [vmem:[%s650_s3] ss:$12 sps:$4 sm:$0xff]   ;;  %437 = vmatprep.mubr.msk.bf16.mxu1 %vm482_vm1, %v480_v4 }
   0x3   :  { %30 = vadd.xlane.f32.xlu0 %v29_v1  ;;  %248 = vmatprep.subr.bf16.mxu0 %v444_v3  ;;  %v447_v6 = vld [vmem:[%s650_s3 + $0x8] ss:$12 sps:$4 sm:$0xff]   ;;  %v450_v17 = vld [vmem:[%s650_s3 + $0x18] ss:$12 sps:$4 sm:$0xff]   ;;  %v451_v18 = vld [vmem:[%s650_s3 + $0x20] ss:$12 sps:$4 sm:$0xff]  }
   0x4   :  { %249 = vmatpush1.bf16.msra.mxu0 %v446_v5  ;;  %v448_v7 = vld [vmem:[%s650_s3 + $0x1c] ss:$12 sps:$4 sm:$0xff]   ;;  %422 = vmatpush3.bf16.msra.mxu1 %v447_v6  ;;  %v452_v19 = vld [vmem:[%s650_s3 + $0x34] ss:$12 sps:$4 sm:$0xff]   ;;  %v455_v21 = vld [vmem:[%s650_s3 + $0x38] ss:$12 sps:$4 sm:$0xff]  }
   0x5   :  { %250 = vmatprep.subr.bf16.mxu0 %v448_v7  ;;  %423 = vmatprep.subr.bf16.mxu1 %v480_v4  ;;  %v456_v22 = vld [vmem:[%s650_s3 + $0x4c] ss:$12 sps:$4 sm:$0xff]   ;;  %v458_v23 = vld [vmem:[%s650_s3 + $0x48] ss:$12 sps:$4 sm:$0xff]   ;;  %v459_v24 = vld [vmem:[%s650_s3 + $0x50] ss:$12 sps:$4 sm:$0xff]  }
   0x6   :  { %v460_v25 = vld [vmem:[%s650_s3 + $0x64] ss:$12 sps:$4 sm:$0xff]   ;;  %v462_v26 = vld [vmem:[%s650_s3 + $0x60] ss:$12 sps:$4 sm:$0xff]   ;;  %v463_v27 = vld [vmem:[%s650_s3 + $0x68] ss:$12 sps:$4 sm:$0xff]  }
   0x7   :  { %26 = vadd.xlane.f32.xlu0 %v24_v2  ;;  %v464_v28 = vld [vmem:[%s650_s3 + $0x7c] ss:$12 sps:$4 sm:$0xff]   ;;  %v466_v29 = vld [vmem:[%s650_s3 + $0x78] ss:$12 sps:$4 sm:$0xff]   ;;  %v467_v30 = vld [vmem:[%s650_s3 + $0x80] ss:$12 sps:$4 sm:$0xff]  }
   0x8   :  { %251 = vmatpush1.bf16.msra.mxu0 %v450_v17  ;;  %424 = vmatpush3.bf16.msra.mxu1 %v451_v18  ;;  %v468_v31 = vld [vmem:[%s650_s3 + $0x94] ss:$12 sps:$4 sm:$0xff]   ;;  %v470_v33 = vld [vmem:[%s650_s3 + $0x90] ss:$12 sps:$4 sm:$0xff]   ;;  %v471_v34 = vld [vmem:[%s650_s3 + $0x98] ss:$12 sps:$4 sm:$0xff]  }
   0x9   :  { %425 = vmatprep.subr.bf16.mxu1 %v480_v4  ;;  %252 = vmatprep.subr.bf16.mxu0 %v452_v19  ;;  %v472_v35 = vld [vmem:[%s650_s3 + $0xac] ss:$12 sps:$4 sm:$0xff]   ;;  %v474_v36 = vld [vmem:[%s650_s3 + $0xa8] ss:$12 sps:$4 sm:$0xff]   ;;  %v475_v37 = vld [vmem:[%s650_s3 + $0xb0] ss:$12 sps:$4 sm:$0xff]  }
   0xa   :  { %v374_v46 = vld [vmem:[%s651_s1] ss:$0 sm:$0xff]  ;;  %v106_v56 = vshrl.u32 %v105_v55, 7 }
   0xb   :  { %v375_v50 = vld [vmem:[%s652_s2] ss:$0 sm:$0xff] }
   0xc   :  { %253 = vmatpush1.bf16.msra.mxu0 %v454_v20  ;;  %426 = vmatpush3.bf16.msra.mxu1 %v455_v21  ;;  %v107_v57 = vsub.s32 0, %v106_v56  ;;  %v115_v58 = vsub.s32 2, %v106_v56  ;;  %v103_v59 = vld [vmem:[%s653_s4] sm:$0x7]  ;;  %v111_v60 = vsub.s32 1, %v106_v56 }
   0xd   :  { %427 = vmatprep.subr.bf16.mxu1 %v480_v4  ;;  %254 = vmatprep.subr.bf16.mxu0 %v456_v22 }
   0xe   :  { %v108_v61 = vrot.slane %v103_v59, %v107_v57  ;;  %v116_v62 = vrot.slane %v103_v59, %v115_v58  ;;  %v112_v63 = vrot.slane %v103_v59, %v111_v60 }
  0x10   :  { %255 = vmatpush1.bf16.msra.mxu0 %v458_v23  ;;  %428 = vmatpush3.bf16.msra.mxu1 %v459_v24 }
  0x11   :  { %429 = vmatprep.subr.bf16.mxu1 %v480_v4  ;;  %256 = vmatprep.subr.bf16.mxu0 %v460_v25 }
  0x14   :  { %257 = vmatpush1.bf16.msra.mxu0 %v462_v26  ;;  %430 = vmatpush3.bf16.msra.mxu1 %v463_v27 }
  0x15   :  { %258 = vmatprep.subr.bf16.mxu0 %v464_v28  ;;  %431 = vmatprep.subr.bf16.mxu1 %v480_v4 }
  0x18   :  { %259 = vmatpush1.bf16.msra.mxu0 %v466_v29  ;;  %432 = vmatpush3.bf16.msra.mxu1 %v467_v30 }
  0x19   :  { %260 = vmatprep.subr.bf16.mxu0 %v468_v31  ;;  %433 = vmatprep.subr.bf16.mxu1 %v480_v4 }
  0x1c   :  { %261 = vmatpush1.bf16.msra.mxu0 %v470_v33  ;;  %434 = vmatpush3.bf16.msra.mxu1 %v471_v34 }
  0x1d   :  { %262 = vmatprep.subr.bf16.mxu0 %v472_v35  ;;  %435 = vmatprep.subr.bf16.mxu1 %v480_v4 }
  0x20   :  { %263 = vmatpush1.bf16.msra.mxu0 %v474_v36  ;;  %436 = vmatpush3.bf16.msra.mxu1 %v475_v37 }
  0x90   :  { %v31_v8 = vpop.xlane.xlu0 %30 }
  0x91   :  { %v34_v9 = vmul.f32 0.0078125, %v31_v8 }
  0x93   :  { %v544_v12 = vsub.f32 %v25_v0, %v34_v9 }
  0x94   :  { %v27_v10 = vpop.xlane.xlu0 %26 }
  0x95   :  { %v33_v11 = vmul.f32 0.0078125, %v27_v10  ;;  %v38_v15 = vmul.f32 %v544_v12, %v544_v12 }
  0x97   :  { %v546_v13 = vsub.f32 %v24_v2, %v33_v11  ;;  %v41_v16 = vsel %vm28_vm0, %v38_v15, 0.0 }
  0x99   :  { %v37_v14 = vmul.f32 %v546_v13, %v546_v13 }
  0x9b   :  { %39 = vadd.xlane.f32.xlu1 %v37_v14 }
  0x9f   :  { %42 = vadd.xlane.f32.xlu1 %v41_v16 }
 0x128   :  { %v40_v38 = vpop.xlane.xlu1 %39 }
 0x129   :  { %v44_v39 = vmul.f32 0.0078125, %v40_v38 }
 0x12b   :  { %v46_v40 = vadd.f32 1e-06, %v44_v39 }
 0x12c   :  { %v43_v41 = vpop.xlane.xlu1 %42 }
 0x12d   :  { %476 = vrsqrt.f32 %v46_v40  ;;  %v45_v42 = vmul.f32 0.0078125, %v43_v41 }
 0x12f   :  { %v47_v43 = vadd.f32 1e-06, %v45_v42 }
 0x131   :  { %478 = vrsqrt.f32 %v47_v43 }
 0x137   :  { %v477_v44 = vpop.eup %476 }
 0x138   :  { %v50_v45 = vmul.f32 %v477_v44, %v546_v13 }
 0x13a   :  { %v59_v49 = vmul.f32 %v374_v46, %v50_v45 }
 0x13b   :  { %v479_v47 = vpop.eup %478 }
 0x13c   :  { %v51_v48 = vmul.f32 %v479_v47, %v544_v12  ;;  %v68_v52 = vadd.f32 %v375_v50, %v59_v49 }
 0x13e   :  { %v60_v51 = vmul.f32 %v374_v46, %v51_v48 }
 0x140   :  { %v69_v53 = vadd.f32 %v375_v50, %v60_v51 }
 0x142   :  { %v70_v54 = vpack.c.bf16 %v69_v53, %v68_v52 }
 0x144   :  { %281 = vmatmul.mubr.bf16.vlgmr.msra.gmra.mrb[0].mxu0 %v70_v54  ;;  %438 = vmatmul.mubr.bf16.vlgmr.msra.gmra.mrb[0].mxu1 %v70_v54 }
 0x217   :  { %v282_v0 = vpop.f32.mrb[0].mxu0  ;;  %v325_v1 = vpop.f32.mrb[0].mxu1 }
 0x218   :  { %v283_v2 = vadd.f32 %v282_v0, %v108_v61  ;;  %v326_v3 = vadd.f32 %v325_v1, %v116_v62  ;;  %v284_v4 = vpop.f32.mrb[1].mxu0  ;;  %v439_v5 = vpop.f32.mrb[1].mxu1 }
 0x219   :  { %v285_v6 = vadd.f32 %v284_v4, %v112_v63  ;;  %v286_v7 = vpop.f32.mrb[2].mxu0  ;;  %v328_v8 = vpop.f32.mrb[2].mxu1 }
 0x21a   :  { %v406_v9 = vpack.c.bf16 %v283_v2, %v283_v2  ;;  %v410_v10 = vpack.c.bf16 %v326_v3, %v326_v3  ;;  %v287_v11 = vadd.f32 %v286_v7, %v108_v61  ;;  %v329_v12 = vadd.f32 %v328_v8, %v116_v62  ;;  %v288_v13 = vpop.f32.mrb[3].mxu0  ;;  %v440_v14 = vpop.f32.mrb[3].mxu1 }
 0x21b   :  { %v408_v15 = vpack.c.bf16 %v285_v6, %v285_v6  ;;  %v289_v16 = vadd.f32 %v288_v13, %v112_v63 }
 0x21c   :  { %340 = vst [vmem:[%s654_s5] sm:$0xf] %v406_v9  ;;  %360 = vst [vmem:[%s655_s7] sm:$0xf] %v410_v10  ;;  %v407_v17 = vpack.c.bf16 %v287_v11, %v287_v11  ;;  %v411_v18 = vpack.c.bf16 %v329_v12, %v329_v12 }
 0x21d   :  { %350 = vst [vmem:[%s656_s6] sm:$0xf] %v408_v15  ;;  %v409_v19 = vpack.c.bf16 %v289_v16, %v289_v16 }
 0x21e   :  { %341 = vst [vmem:[%s654_s5 + $0x4] sm:$0x1] %v407_v17  ;;  %361 = vst [vmem:[%s655_s7 + $0x4] sm:$0x1] %v411_v18 }
 0x21f   :  { %351 = vst [vmem:[%s656_s6 + $0x4] sm:$0x1] %v409_v19 }

// kernel: vit_linear_forward.14
= control target key start
LH: loop header
LB: loop body
LE: loop exit
PB: predicated region body
PF: predicated region fallthrough
CT: control target
= control target key end

     0   :  { %s976_s12 = smov 0   ;;  %s1093_s0 = inlined_call_operand.vmem [shape: bf16[2,5,128], index: 0, kind: input, shape index: {}]   ;;  %s1094_s1 = inlined_call_operand.vmem [shape: bf16[2,5,128], index: 1, kind: input, shape index: {}]   ;;  %s1095_s2 = inlined_call_operand.vmem [shape: bf16[2,5,128], index: 2, kind: input, shape index: {}]   ;;  %s1096_s3 = inlined_call_operand.vmem [shape: bf16[2,5,128], index: 3, kind: output, shape index: {}]  }
   0x1 LB: > { %s805_s13 = sadd.s32 4294967295, %s948_s12   ;;  %p809_p0 = scmp.ge.s32.totalorder %s948_s12, 1  ;;  %s948_s12 = sphi %s976_s12, %s13_s12  }
   0x2   : > { %p154_p1 = scmp.lt.s32.totalorder %s948_s12, 3 }
   0x4   : > { %p155_p2 = pnand %p809_p0, %p154_p1 }
   0x5   : > { %p184_p3 = scmp.lt.s32.totalorder (!%p155_p2), %s805_s13, 1  ;;  %v950_v0 = vmov (!%p155_p2), 0.0   ;;  %vm951_vm0 = vmmov (!%p155_p2), 0   ;;  %vm204_vm1 = vcmask (!%p155_p2), 261120   ;;  %vm252_vm2 = vcmask (!%p155_p2), 36864   ;;  %s952_s21 = smov (!%p155_p2), 96  }
   0x6   : > { %158 = sbr.rel (%p155_p2) target bundleno = 1477 (0x5c5), region = 32  ;;  %855 = vmatprep.subr.bf16.mxu0 (!%p155_p2), %v950_v0  ;;  %857 = vmatprep.mubr.msk.bf16.mxu0 (!%p155_p2), %vm951_vm0, %v950_v0  ;;  %s953_s22 = smov (!%p155_p2), 64   ;;  %vm269_vm3 = vcmask (!%p155_p2), 1041408   ;;  %vm270_vm4 = vcmask (!%p155_p2), 1042432   ;;  %v955_v21 = vmov (!%p155_p2), 65535   ;;  %vm265_vm5 = vcmask (!%p155_p2), 39936  }
   0x7   : > { %861 = vmatprep.subr.bf16.mxu1 (!%p155_p2), %v950_v0  ;;  %863 = vmatprep.mubr.msk.bf16.mxu1 (!%p155_p2), %vm951_vm0, %v950_v0  ;;  %s954_s23 = smov (!%p155_p2), 32   ;;  %v271_v22 = vsel (!%p155_p2), %vm269_vm3, 4294967295, %v955_v21  ;;  %vm317_vm6 = vcmask (!%p155_p2), 256000   ;;  %vm318_vm7 = vsmask.f32 (!%p155_p2), 2304  ;;  %vm453_vm9 = vcmask (!%p155_p2), 518400  }
   0x8   : > { %v1024_v23 = vsel (!%p155_p2), %vm270_vm4, %v271_v22, 0  ;;  %vm319_vm8 = vmand (!%p155_p2), %vm317_vm6, %vm318_vm7  ;;  %vm588_vm11 = vcmask (!%p155_p2), 780800   ;;  %vm723_vm13 = vcmask (!%p155_p2), 1043200  }
   0x9   : > { %vm454_vm10 = vmand (!%p155_p2), %vm453_vm9, %vm318_vm7 }
   0xa   : > { %vm589_vm12 = vmand (!%p155_p2), %vm588_vm11, %vm318_vm7 }
   0xb   : > { %vm724_vm14 = vmand (!%p155_p2), %vm723_vm13, %vm318_vm7 }
   0xd   : > { %s1098_s13 = smov (!%p184_p3, %s805_s13), 1 }
   0xe   : > { %s990_s14 = sshll.u32 %s1098_s13, 2 }
   0xf   : > { %s996_s17 = scalar_lea.vmem %s1094_s1, %s990_s14  ;;  %s187_s20 = scalar_lea.vmem %s1093_s0, %s990_s14 }
  0x10   : > { %v202_v1 = vld [vmem:[%s996_s17] sm:$0x7]  ;;  %s1021_s26 = scalar_lea.vmem %s1095_s2, %s990_s14  ;;  %s1049_s29 = scalar_lea.vmem %s1096_s3, %s990_s14 }
  0x11   : > { %v209_v2 = vsel %vm204_vm1, %v202_v1, 0  ;;  %v201_v3 = vld [vmem:[%s187_s20] sm:$0x7] }
  0x12   : > { %856 = vmatpush3.bf16.xpose.msra.mxu0 %v209_v2  ;;  %v917_v10 = vld [vmem:[%s996_s17] ss:$0 sps:$4 sm:$0x77]  }
  0x13   : > { %873 = vmatprep.subr.bf16.mxu0 %v950_v0  ;;  %334 = vrot.lane.b32.xlu1 %v917_v10, %s952_s21  ;;  %v918_v11 = vld [vmem:[%s187_s20] ss:$0 sps:$4 sm:$0x77]  }
  0x14   : > { %v920_v12 = vld [vmem:[%s187_s20] ss:$0 sps:$4 sm:$0x77]  }
  0x15   : > { %v921_v13 = vld [vmem:[%s996_s17] ss:$0 sps:$4 sm:$0x77]  }
  0x16   : > { %v922_v14 = vld [vmem:[%s187_s20] ss:$0 sps:$4 sm:$0x77]  }
  0x17   : > { %329 = vrot.lane.b32.xlu1 %v918_v11, %s952_s21  ;;  %v203_v20 = vld [vmem:[%s1021_s26] sm:$0x7] }
  0x18   : > { %v274_v24 = vand.u32 %v1024_v23, %v203_v20  ;;  %v919_v25 = vld [vmem:[%s996_s17] ss:$0 sps:$4 sm:$0x77]  }
  0x19   : > { %858 = vmatmul.mubr.msk.bf16.vlgmr.msra.gmra.mrb[0].mxu0 %vm204_vm1, %v201_v3  ;;  %v320_v40 = vld [vmem:[%s1049_s29] sm:$0x7] }
  0x1a   : > { %875 = vmatprep.mubr.msk.bf16.mxu0 %vm951_vm0, %v950_v0  ;;  %862 = vmatpush3.bf16.msra.mxu1 %v274_v24  ;;  %v923_v11 = vld [vmem:[%s1021_s26] ss:$0 sps:$4 sm:$0x77]  }
  0x1b   : > { %464 = vrot.lane.b32.xlu1 %v920_v12, %s953_s22  ;;  %867 = vmatprep.subr.bf16.mxu1 %v950_v0  ;;  %v924_v12 = vld [vmem:[%s1021_s26] ss:$0 sps:$4 sm:$0x77]  }
  0x1f   : > { %604 = vrot.lane.b32.xlu1 %v921_v13, %s954_s23 }
  0x23   : > { %599 = vrot.lane.b32.xlu1 %v922_v14, %s954_s23 }
  0x85   : > { %v335_v28 = vpop.permute.xlu1 %334 }
  0x86   : > { %v340_v30 = vsel %vm204_vm1, %v335_v28, 0 }
  0x89   : > { %v330_v32 = vpop.permute.xlu1 %329 }
  0x8d   : > { %v465_v34 = vpop.permute.xlu1 %464 }
  0x91   : > { %v605_v36 = vpop.permute.xlu1 %604 }
  0x92   : > { %v610_v37 = vsel %vm204_vm1, %v605_v36, 0 }
  0x95   : > { %v600_v38 = vpop.permute.xlu1 %599 }
  0xec   : > { %v245_v4 = vpop.f32.mrb[0].mxu0 }
  0xed   : > { %v251_v5 = vmul.f32 0.17677669, %v245_v4  ;;  %v859_v6 = vpop.f32.mrb[1].mxu0 }
  0xee   : > { %v248_v7 = vpop.f32.mrb[2].mxu0 }
  0xef   : > { %v860_v8 = vpop.f32.mrb[3].mxu0  ;;  %v253_v9 = vsel %vm252_vm2, %v251_v5, -inf }
  0xf0   : > { %254 = vmax.xlane.f32.xlu0 %v253_v9 }
 0x17d   : > { %v255_v15 = vpop.xlane.xlu0 %254 }
 0x17e   : > { %v256_v16 = vsub.f32 %v251_v5, %v255_v15 }
 0x180   : > { %v257_v17 = vmul.f32 1.442695, %v256_v16 }
 0x182   : > { %926 = vpow2.f32 %v257_v17 }
 0x18c   : > { %v927_v18 = vpop.eup %926 }
 0x18d   : > { %v259_v19 = vsel %vm252_vm2, %v927_v18, 0.0 }
 0x18e   : > { %260 = vadd.xlane.f32.xlu0 %v259_v19 }
 0x1a4   : > { %469 = vrot.lane.b32.xlu0 %v919_v25, %s953_s22 }
 0x21b   : > { %v261_v26 = vpop.xlane.xlu0 %260 }
 0x21c   : > { %928 = vrcp.f32 %v261_v26 }
 0x21f   : > { %v470_v33 = vpop.permute.xlu0 %469 }
 0x220   : > { %v475_v35 = vsel %vm204_vm1, %v470_v33, 0 }
 0x226   : > { %v929_v27 = vpop.eup %928 }
 0x227   : > { %v263_v29 = vmul.f32 %v929_v27, %v927_v18  ;;  %v925_v18 = vld [vmem:[%s1021_s26] ss:$0 sps:$4 sm:$0x77]  }
 0x229   : > { %v264_v31 = vpack.c.bf16 %v263_v29, %v263_v29 }
 0x22b   : > { %864 = vmatmul.mubr.msk.bf16.vlgmr.msra.gmra.mrb[0].mxu1 %vm265_vm5, %v264_v31 }
 0x22c   : > { %868 = vmatpush3.bf16.xpose.msra.mxu1 %v340_v30  ;;  %869 = vmatprep.mubr.msk.bf16.mxu1 %vm951_vm0, %v950_v0 }
 0x22d   : > { %879 = vmatprep.subr.bf16.mxu1 %v950_v0 }
 0x233   : > { %870 = vmatmul.mubr.msk.bf16.vlgmr.msra.gmra.mrb[4].mxu1 %vm204_vm1, %v330_v32 }
 0x234   : > { %880 = vmatpush3.bf16.xpose.msra.mxu1 %v475_v35  ;;  %881 = vmatprep.mubr.msk.bf16.mxu1 %vm951_vm0, %v950_v0 }
 0x235   : > { %891 = vmatprep.subr.bf16.mxu1 %v950_v0 }
 0x23b   : > { %882 = vmatmul.mubr.msk.bf16.vlgmr.msra.gmra.mrb[8].mxu1 %vm204_vm1, %v465_v34 }
 0x23c   : > { %892 = vmatpush3.bf16.xpose.msra.mxu1 %v610_v37  ;;  %893 = vmatprep.mubr.msk.bf16.mxu1 %vm951_vm0, %v950_v0 }
 0x243   : > { %894 = vmatmul.mubr.msk.bf16.vlgmr.msra.gmra.mrb[12].mxu1 %vm204_vm1, %v600_v38 }
 0x2fe   : > { %v310_v39 = vpop.f32.mrb[0].mxu1 }
 0x2ff   : > { %v316_v41 = vpack.c.bf16 %v310_v39, %v310_v39  ;;  %v865_v42 = vpop.f32.mrb[1].mxu1 }
 0x300   : > { %v313_v43 = vpop.f32.mrb[2].mxu1 }
 0x301   : > { %v321_v44 = vsel %vm319_vm8, %v316_v41, %v320_v40  ;;  %v866_v45 = vpop.f32.mrb[3].mxu1 }
 0x302   : > { %322 = vst [vmem:[%s1049_s29] sm:$0x7] %v321_v44 }
 0x306   : > { %v376_v46 = vpop.f32.mrb[4].mxu1 }
 0x307   : > { %v382_v47 = vmul.f32 0.17677669, %v376_v46  ;;  %v871_v48 = vpop.f32.mrb[5].mxu1 }
 0x308   : > { %v379_v49 = vpop.f32.mrb[6].mxu1 }
 0x309   : > { %v872_v50 = vpop.f32.mrb[7].mxu1  ;;  %v383_v51 = vsel %vm252_vm2, %v382_v47, -inf }
 0x30a   : > { %384 = vmax.xlane.f32.xlu1 %v383_v51  ;;  %v455_v51 = vld [vmem:[%s1049_s29] sm:$0x7] }
 0x30e   : > { %v511_v52 = vpop.f32.mrb[8].mxu1 }
 0x30f   : > { %v517_v53 = vmul.f32 0.17677669, %v511_v52  ;;  %v883_v54 = vpop.f32.mrb[9].mxu1 }
 0x310   : > { %v514_v55 = vpop.f32.mrb[10].mxu1 }
 0x311   : > { %v518_v56 = vsel %vm252_vm2, %v517_v53, -inf  ;;  %v884_v57 = vpop.f32.mrb[11].mxu1 }
 0x312   : > { %519 = vmax.xlane.f32.xlu0 %v518_v56 }
 0x316   : > { %v646_v58 = vpop.f32.mrb[12].mxu1 }
 0x317   : > { %v652_v59 = vmul.f32 0.17677669, %v646_v58  ;;  %v895_v60 = vpop.f32.mrb[13].mxu1 }
 0x318   : > { %v649_v61 = vpop.f32.mrb[14].mxu1 }
 0x319   : > { %v653_v62 = vsel %vm252_vm2, %v652_v59, -inf  ;;  %v896_v63 = vpop.f32.mrb[15].mxu1 }
 0x31a   : > { %654 = vmax.xlane.f32.xlu1 %v653_v62 }
 0x397   : > { %v385_v1 = vpop.xlane.xlu1 %384 }
 0x398   : > { %v386_v2 = vsub.f32 %v382_v47, %v385_v1 }
 0x39a   : > { %v387_v3 = vmul.f32 1.442695, %v386_v2 }
 0x39c   : > { %930 = vpow2.f32 %v387_v3 }
 0x39f   : > { %v520_v4 = vpop.xlane.xlu0 %519 }
 0x3a0   : > { %v521_v5 = vsub.f32 %v517_v53, %v520_v4 }
 0x3a2   : > { %v522_v6 = vmul.f32 1.442695, %v521_v5 }
 0x3a4   : > { %932 = vpow2.f32 %v522_v6 }
 0x3a6   : > { %v931_v7 = vpop.eup %930 }
 0x3a7   : > { %v389_v8 = vsel %vm252_vm2, %v931_v7, 0.0  ;;  %v655_v13 = vpop.xlane.xlu1 %654 }
 0x3a8   : > { %390 = vadd.xlane.f32.xlu1 %v389_v8  ;;  %v656_v14 = vsub.f32 %v652_v59, %v655_v13 }
 0x3aa   : > { %v657_v15 = vmul.f32 1.442695, %v656_v14 }
 0x3ac   : > { %934 = vpow2.f32 %v657_v15 }
 0x3ae   : > { %v933_v9 = vpop.eup %932 }
 0x3af   : > { %v524_v10 = vsel %vm252_vm2, %v933_v9, 0.0 }
 0x3b0   : > { %525 = vadd.xlane.f32.xlu0 %v524_v10 }
 0x3b6   : > { %v935_v16 = vpop.eup %934 }
 0x3b7   : > { %v659_v17 = vsel %vm252_vm2, %v935_v16, 0.0 }
 0x3b9   : > { %533 = vrot.lane.b32.xlu1 %v923_v11, %s953_s22 }
 0x3c6   : > { %398 = vrot.lane.b32.xlu0 %v924_v12, %s952_s21 }
 0x3dd   : > { %660 = vadd.xlane.f32.xlu1 %v659_v17 }
 0x3ee   : > { %668 = vrot.lane.b32.xlu1 %v925_v18, %s954_s23 }
 0x435   : > { %v391_v19 = vpop.xlane.xlu1 %390 }
 0x436   : > { %936 = vrcp.f32 %v391_v19 }
 0x439   : > { %v534_v26 = vpop.permute.xlu1 %533 }
 0x43a   : > { %v539_v28 = vand.u32 %v534_v26, %v1024_v23 }
 0x43d   : > { %v526_v20 = vpop.xlane.xlu0 %525 }
 0x43e   : > { %938 = vrcp.f32 %v526_v20 }
 0x440   : > { %v937_v21 = vpop.eup %936 }
 0x441   : > { %v393_v22 = vmul.f32 %v937_v21, %v931_v7  ;;  %v399_v24 = vpop.permute.xlu0 %398 }
 0x442   : > { %v404_v25 = vand.u32 %v399_v24, %v1024_v23 }
 0x443   : > { %v394_v27 = vpack.c.bf16 %v393_v22, %v393_v22 }
 0x444   : > { %874 = vmatpush3.bf16.msra.mxu0 %v404_v25 }
 0x445   : > { %885 = vmatprep.subr.bf16.mxu0 %v950_v0 }
 0x447   : > { %876 = vmatmul.mubr.msk.bf16.vlgmr.msra.gmra.mrb[4].mxu0 %vm265_vm5, %v394_v27 }
 0x448   : > { %v939_v29 = vpop.eup %938  ;;  %886 = vmatpush3.bf16.msra.mxu0 %v539_v28  ;;  %887 = vmatprep.mubr.msk.bf16.mxu0 %vm951_vm0, %v950_v0 }
 0x449   : > { %v528_v30 = vmul.f32 %v939_v29, %v933_v9  ;;  %897 = vmatprep.subr.bf16.mxu0 %v950_v0 }
 0x44b   : > { %v529_v31 = vpack.c.bf16 %v528_v30, %v528_v30 }
 0x44f   : > { %888 = vmatmul.mubr.msk.bf16.vlgmr.msra.gmra.mrb[8].mxu0 %vm265_vm5, %v529_v31 }
 0x450   : > { %899 = vmatprep.mubr.msk.bf16.mxu0 %vm951_vm0, %v950_v0 }
 0x46a   : > { %v661_v32 = vpop.xlane.xlu1 %660 }
 0x46b   : > { %940 = vrcp.f32 %v661_v32 }
 0x46e   : > { %v669_v33 = vpop.permute.xlu1 %668 }
 0x46f   : > { %v674_v34 = vand.u32 %v669_v33, %v1024_v23 }
 0x471   : > { %898 = vmatpush3.bf16.msra.mxu0 %v674_v34 }
 0x475   : > { %v941_v35 = vpop.eup %940 }
 0x476   : > { %v663_v36 = vmul.f32 %v941_v35, %v935_v16 }
 0x478   : > { %v664_v37 = vpack.c.bf16 %v663_v36, %v663_v36 }
 0x47a   : > { %900 = vmatmul.mubr.msk.bf16.vlgmr.msra.gmra.mrb[12].mxu0 %vm265_vm5, %v664_v37 }
 0x51a   : > { %v440_v38 = vpop.f32.mrb[4].mxu0 }
 0x51b   : > { %v836_v39 = vpack.c.bf16 %v440_v38, %v440_v38  ;;  %v877_v40 = vpop.f32.mrb[5].mxu0 }
 0x51c   : > { %v443_v41 = vpop.f32.mrb[6].mxu0 }
 0x51d   : > { %450 = vrot.lane.b32.xlu0 %v836_v39, %s954_s23  ;;  %v878_v42 = vpop.f32.mrb[7].mxu0 }
 0x522   : > { %v575_v0 = vpop.f32.mrb[8].mxu0 }
 0x523   : > { %v837_v43 = vpack.c.bf16 %v575_v0, %v575_v0  ;;  %v889_v44 = vpop.f32.mrb[9].mxu0 }
 0x524   : > { %v578_v45 = vpop.f32.mrb[10].mxu0 }
 0x525   : > { %585 = vrot.lane.b32.xlu1 %v837_v43, %s953_s22  ;;  %v890_v23 = vpop.f32.mrb[11].mxu0 }
 0x54d   : > { %v710_v46 = vpop.f32.mrb[12].mxu0 }
 0x54e   : > { %v838_v47 = vpack.c.bf16 %v710_v46, %v710_v46  ;;  %v901_v48 = vpop.f32.mrb[13].mxu0 }
 0x54f   : > { %v713_v49 = vpop.f32.mrb[14].mxu0 }
 0x550   : > { %720 = vrot.lane.b32.xlu0 %v838_v47, %s952_s21  ;;  %v902_v50 = vpop.f32.mrb[15].mxu0 }
 0x58f   : > { %v451_v52 = vpop.permute.xlu0 %450 }
 0x590   : > { %v456_v53 = vsel %vm454_vm10, %v451_v52, %v455_v51 }
 0x591   : > { %457 = vst [vmem:[%s1049_s29] sm:$0x7] %v456_v53 }
 0x597   : > { %v586_v54 = vpop.permute.xlu1 %585 }
 0x598   : > { %v590_v55 = vld [vmem:[%s1049_s29] sm:$0x7] }
 0x599   : > { %v591_v56 = vsel %vm589_vm12, %v586_v54, %v590_v55 }
 0x59a   : > { %592 = vst [vmem:[%s1049_s29] sm:$0x7] %v591_v56 }
 0x5a1   : > { %v725_v57 = vld [vmem:[%s1049_s29] sm:$0x7] }
 0x5c2   : > { %v721_v58 = vpop.permute.xlu0 %720 }
 0x5c3   : > { %v726_v59 = vsel %vm724_vm14, %v721_v58, %v725_v57 }
 0x5c4   : > { %727 = vst [vmem:[%s1049_s29] sm:$0x7] %v726_v59 }
 0x5c5 PF: > { %s13_s12 = sadd.s32 1, %s948_s12  }
 0x5c6   : > { %p10_p4 = scmp.ge.s32.totalorder %s13_s12, 4  }
 0x5c8   :  { %12 = sbr.rel (!%p10_p4) target bundleno = 1 (0x1), region = 68 }

// kernel: vit_linear_forward.12
= control target key start
LH: loop header
LB: loop body
LE: loop exit
PB: predicated region body
PF: predicated region fallthrough
CT: control target
= control target key end

     0   :  { %s3414_s1 = inlined_call_operand.vmem [shape: bf16[3072,128], index: 1, kind: input, shape index: {}]   ;;  %s3415_s0 = inlined_call_operand.vmem [shape: f32[8,3072], index: 0, kind: input, shape index: {}]   ;;  %s3416_s2 = inlined_call_operand.vmem [shape: f32[1,128], index: 2, kind: input, shape index: {}]   ;;  %s3417_s3 = inlined_call_operand.vmem [shape: f32[8,128], index: 3, kind: output, shape index: {}]  }
   0x1   :  { %v2548_v0 = vld [vmem:[%s3414_s1 + $0x40] sm:$0xff]   ;;  %v2552_v4 = vld [vmem:[%s3414_s1 + $0x48] sm:$0xff]   ;;  %v2556_v8 = vld [vmem:[%s3414_s1 + $0x50] sm:$0xff]  }
   0x2   :  { %v2549_v1 = vld [vmem:[%s3414_s1 + $0xc0] sm:$0xff]   ;;  %2284 = vmatprep.subr.bf16.mxu0 %v2548_v0  ;;  %v2553_v5 = vld [vmem:[%s3414_s1 + $0xc8] sm:$0xff]   ;;  %v2557_v9 = vld [vmem:[%s3414_s1 + $0xd0] sm:$0xff]  }
   0x3   :  { %v2550_v2 = vld [vmem:[%s3414_s1] sm:$0xff]   ;;  %2306 = vmatprep.subr.bf16.mxu1 %v2549_v1  ;;  %v2554_v6 = vld [vmem:[%s3414_s1 + $0x8] sm:$0xff]   ;;  %v2558_v10 = vld [vmem:[%s3414_s1 + $0x10] sm:$0xff]  }
   0x4   :  { %v2551_v3 = vld [vmem:[%s3414_s1 + $0x80] sm:$0xff]   ;;  %2285 = vmatpush3.bf16.msra.mxu0 %v2550_v2  ;;  %v2555_v7 = vld [vmem:[%s3414_s1 + $0x88] sm:$0xff]   ;;  %v2559_v11 = vld [vmem:[%s3414_s1 + $0x90] sm:$0xff]  }
   0x5   :  { %2307 = vmatpush3.bf16.msra.mxu1 %v2551_v3  ;;  %2286 = vmatprep.subr.bf16.mxu0 %v2552_v4  ;;  %v2560_v12 = vld [vmem:[%s3414_s1 + $0x58] sm:$0xff]   ;;  %v2564_v16 = vld [vmem:[%s3414_s1 + $0x60] sm:$0xff]   ;;  %v2568_v20 = vld [vmem:[%s3414_s1 + $0x68] sm:$0xff]  }
   0x6   :  { %2308 = vmatprep.subr.bf16.mxu1 %v2553_v5  ;;  %v2561_v13 = vld [vmem:[%s3414_s1 + $0xd8] sm:$0xff]   ;;  %v2565_v17 = vld [vmem:[%s3414_s1 + $0xe0] sm:$0xff]   ;;  %v2569_v21 = vld [vmem:[%s3414_s1 + $0xe8] sm:$0xff]  }
   0x7   :  { %v2562_v14 = vld [vmem:[%s3414_s1 + $0x18] sm:$0xff]   ;;  %v2566_v18 = vld [vmem:[%s3414_s1 + $0x20] sm:$0xff]   ;;  %v2570_v22 = vld [vmem:[%s3414_s1 + $0x28] sm:$0xff]  }
   0x8   :  { %2287 = vmatpush3.bf16.msra.mxu0 %v2554_v6  ;;  %v2563_v15 = vld [vmem:[%s3414_s1 + $0x98] sm:$0xff]   ;;  %v2567_v19 = vld [vmem:[%s3414_s1 + $0xa0] sm:$0xff]   ;;  %v2571_v23 = vld [vmem:[%s3414_s1 + $0xa8] sm:$0xff]  }
   0x9   :  { %2309 = vmatpush3.bf16.msra.mxu1 %v2555_v7  ;;  %2288 = vmatprep.subr.bf16.mxu0 %v2556_v8  ;;  %v2572_v24 = vld [vmem:[%s3414_s1 + $0x70] sm:$0xff]   ;;  %v2576_v28 = vld [vmem:[%s3414_s1 + $0x78] sm:$0xff]   ;;  %v16_v32 = vld [vmem:[%s3415_s0 + $0x8] sm:$0xff] }
   0xa   :  { %2310 = vmatprep.subr.bf16.mxu1 %v2557_v9  ;;  %v2573_v25 = vld [vmem:[%s3414_s1 + $0xf0] sm:$0xff]   ;;  %v2577_v29 = vld [vmem:[%s3414_s1 + $0xf8] sm:$0xff]   ;;  %v15_v34 = vld [vmem:[%s3415_s0] sm:$0xff]  ;;  %v40_v35 = vpack.c.bf16 %v16_v32, %v16_v32 }
   0xb   :  { %v2574_v26 = vld [vmem:[%s3414_s1 + $0x30] sm:$0xff]   ;;  %v2578_v30 = vld [vmem:[%s3414_s1 + $0x38] sm:$0xff]   ;;  %v39_v37 = vpack.c.bf16 %v15_v34, %v15_v34  ;;  %v2580_v40 = vld [vmem:[%s3414_s1 + $0x140] sm:$0xff]  }
   0xc   :  { %2289 = vmatpush3.bf16.msra.mxu0 %v2558_v10  ;;  %v2575_v27 = vld [vmem:[%s3414_s1 + $0xb0] sm:$0xff]   ;;  %v2579_v31 = vld [vmem:[%s3414_s1 + $0xb8] sm:$0xff]   ;;  %1638 = vmatprep.mubr.bf16.mxu0 %v40_v35  ;;  %v2581_v41 = vld [vmem:[%s3414_s1 + $0x1c0] sm:$0xff]  }
   0xd   :  { %2311 = vmatpush3.bf16.msra.mxu1 %v2559_v11  ;;  %2290 = vmatprep.subr.bf16.mxu0 %v2560_v12  ;;  %v18_v33 = vld [vmem:[%s3415_s0 + $0x18] sm:$0xff]  ;;  %v17_v38 = vld [vmem:[%s3415_s0 + $0x10] sm:$0xff]  ;;  %v2582_v42 = vld [vmem:[%s3414_s1 + $0x100] sm:$0xff]  }
   0xe   :  { %2312 = vmatprep.subr.bf16.mxu1 %v2561_v13  ;;  %v42_v36 = vpack.c.bf16 %v18_v33, %v18_v33  ;;  %v41_v39 = vpack.c.bf16 %v17_v38, %v17_v38  ;;  %v2583_v43 = vld [vmem:[%s3414_s1 + $0x180] sm:$0xff]   ;;  %v2584_v44 = vld [vmem:[%s3414_s1 + $0x148] sm:$0xff]   ;;  %v2588_v48 = vld [vmem:[%s3414_s1 + $0x150] sm:$0xff]  }
   0xf   :  { %v2585_v45 = vld [vmem:[%s3414_s1 + $0x1c8] sm:$0xff]   ;;  %v2589_v49 = vld [vmem:[%s3414_s1 + $0x1d0] sm:$0xff]   ;;  %v2592_v52 = vld [vmem:[%s3414_s1 + $0x158] sm:$0xff]  }
  0x10   :  { %2291 = vmatpush3.bf16.msra.mxu0 %v2562_v14  ;;  %1678 = vmatprep.mubr.bf16.mxu1 %v42_v36  ;;  %v2586_v46 = vld [vmem:[%s3414_s1 + $0x108] sm:$0xff]   ;;  %v2590_v50 = vld [vmem:[%s3414_s1 + $0x110] sm:$0xff]   ;;  %v2593_v53 = vld [vmem:[%s3414_s1 + $0x1d8] sm:$0xff]  }
  0x11   :  { %2313 = vmatpush3.bf16.msra.mxu1 %v2563_v15  ;;  %2292 = vmatprep.subr.bf16.mxu0 %v2564_v16  ;;  %v2587_v47 = vld [vmem:[%s3414_s1 + $0x188] sm:$0xff]   ;;  %v2591_v51 = vld [vmem:[%s3414_s1 + $0x190] sm:$0xff]   ;;  %v2594_v54 = vld [vmem:[%s3414_s1 + $0x118] sm:$0xff]  }
  0x12   :  { %2314 = vmatprep.subr.bf16.mxu1 %v2565_v17  ;;  %v2595_v55 = vld [vmem:[%s3414_s1 + $0x198] sm:$0xff]   ;;  %v2596_v56 = vld [vmem:[%s3414_s1 + $0x160] sm:$0xff]   ;;  %v2600_v60 = vld [vmem:[%s3414_s1 + $0x168] sm:$0xff]  }
  0x13   :  { %v2597_v57 = vld [vmem:[%s3414_s1 + $0x1e0] sm:$0xff]   ;;  %v2601_v61 = vld [vmem:[%s3414_s1 + $0x1e8] sm:$0xff]   ;;  %v2604_v0 = vld [vmem:[%s3414_s1 + $0x170] sm:$0xff]  }
  0x14   :  { %2293 = vmatpush3.bf16.msra.mxu0 %v2566_v18  ;;  %v2598_v58 = vld [vmem:[%s3414_s1 + $0x120] sm:$0xff]   ;;  %v2602_v62 = vld [vmem:[%s3414_s1 + $0x128] sm:$0xff]   ;;  %v2605_v1 = vld [vmem:[%s3414_s1 + $0x1f0] sm:$0xff]  }
  0x15   :  { %2315 = vmatpush3.bf16.msra.mxu1 %v2567_v19  ;;  %2294 = vmatprep.subr.bf16.mxu0 %v2568_v20  ;;  %v2599_v59 = vld [vmem:[%s3414_s1 + $0x1a0] sm:$0xff]   ;;  %v2603_v63 = vld [vmem:[%s3414_s1 + $0x1a8] sm:$0xff]   ;;  %v2606_v2 = vld [vmem:[%s3414_s1 + $0x130] sm:$0xff]  }
  0x16   :  { %2316 = vmatprep.subr.bf16.mxu1 %v2569_v21  ;;  %v2607_v3 = vld [vmem:[%s3414_s1 + $0x1b0] sm:$0xff]   ;;  %v2608_v4 = vld [vmem:[%s3414_s1 + $0x178] sm:$0xff]   ;;  %v20_v8 = vld [vmem:[%s3415_s0 + $0x28] sm:$0xff] }
  0x17   :  { %v2609_v5 = vld [vmem:[%s3414_s1 + $0x1f8] sm:$0xff]   ;;  %v44_v10 = vpack.c.bf16 %v20_v8, %v20_v8  ;;  %v19_v12 = vld [vmem:[%s3415_s0 + $0x20] sm:$0xff]  ;;  %v21_v13 = vld [vmem:[%s3415_s0 + $0x30] sm:$0xff] }
  0x18   :  { %2295 = vmatpush3.bf16.msra.mxu0 %v2570_v22  ;;  %v2610_v6 = vld [vmem:[%s3414_s1 + $0x138] sm:$0xff]   ;;  %v43_v14 = vpack.c.bf16 %v19_v12, %v19_v12  ;;  %v45_v15 = vpack.c.bf16 %v21_v13, %v21_v13  ;;  %v2612_v16 = vld [vmem:[%s3414_s1 + $0x240] sm:$0xff]   ;;  %v2616_v20 = vld [vmem:[%s3414_s1 + $0x248] sm:$0xff]  }
  0x19   :  { %2317 = vmatpush3.bf16.msra.mxu1 %v2571_v23  ;;  %2296 = vmatprep.subr.bf16.mxu0 %v2572_v24  ;;  %v2611_v7 = vld [vmem:[%s3414_s1 + $0x1b8] sm:$0xff]   ;;  %v2613_v17 = vld [vmem:[%s3414_s1 + $0x2c0] sm:$0xff]   ;;  %v2617_v21 = vld [vmem:[%s3414_s1 + $0x2c8] sm:$0xff]  }
  0x1a   :  { %2318 = vmatprep.subr.bf16.mxu1 %v2573_v25  ;;  %v22_v9 = vld [vmem:[%s3415_s0 + $0x38] sm:$0xff]  ;;  %v2614_v18 = vld [vmem:[%s3414_s1 + $0x200] sm:$0xff]   ;;  %v2618_v22 = vld [vmem:[%s3414_s1 + $0x208] sm:$0xff]  }
  0x1b   :  { %v46_v11 = vpack.c.bf16 %v22_v9, %v22_v9  ;;  %v2615_v19 = vld [vmem:[%s3414_s1 + $0x280] sm:$0xff]   ;;  %v2619_v23 = vld [vmem:[%s3414_s1 + $0x288] sm:$0xff]   ;;  %v2620_v24 = vld [vmem:[%s3414_s1 + $0x250] sm:$0xff]  }
  0x1c   :  { %2297 = vmatpush3.bf16.msra.mxu0 %v2574_v26  ;;  %v2621_v25 = vld [vmem:[%s3414_s1 + $0x2d0] sm:$0xff]   ;;  %v2628_v32 = vld [vmem:[%s3414_s1 + $0x260] sm:$0xff]   ;;  %v2632_v36 = vld [vmem:[%s3414_s1 + $0x268] sm:$0xff]  }
  0x1d   :  { %2319 = vmatpush3.bf16.msra.mxu1 %v2575_v27  ;;  %2298 = vmatprep.subr.bf16.mxu0 %v2576_v28  ;;  %v2622_v26 = vld [vmem:[%s3414_s1 + $0x210] sm:$0xff]   ;;  %v2624_v28 = vld [vmem:[%s3414_s1 + $0x258] sm:$0xff]   ;;  %v2629_v33 = vld [vmem:[%s3414_s1 + $0x2e0] sm:$0xff]  }
  0x1e   :  { %2320 = vmatprep.subr.bf16.mxu1 %v2577_v29  ;;  %v2623_v27 = vld [vmem:[%s3414_s1 + $0x290] sm:$0xff]   ;;  %v2625_v29 = vld [vmem:[%s3414_s1 + $0x2d8] sm:$0xff]   ;;  %v2630_v34 = vld [vmem:[%s3414_s1 + $0x220] sm:$0xff]  }
  0x1f   :  { %v2631_v35 = vld [vmem:[%s3414_s1 + $0x2a0] sm:$0xff]   ;;  %v2634_v38 = vld [vmem:[%s3414_s1 + $0x228] sm:$0xff]  }
  0x20   :  { %2299 = vmatpush3.bf16.msra.mxu0 %v2578_v30  ;;  %v2626_v30 = vld [vmem:[%s3414_s1 + $0x218] sm:$0xff]   ;;  %v2660_v8 = vld [vmem:[%s3414_s1 + $0x360] sm:$0xff]   ;;  %v2664_v12 = vld [vmem:[%s3414_s1 + $0x368] sm:$0xff]  }
  0x21   :  { %2321 = vmatpush3.bf16.msra.mxu1 %v2579_v31  ;;  %2328 = vmatprep.subr.bf16.mxu0 %v2580_v40  ;;  %v2627_v31 = vld [vmem:[%s3414_s1 + $0x298] sm:$0xff]   ;;  %v2636_v40 = vld [vmem:[%s3414_s1 + $0x270] sm:$0xff]   ;;  %v2661_v9 = vld [vmem:[%s3414_s1 + $0x3e0] sm:$0xff]  }
  0x22   :  { %2350 = vmatprep.subr.bf16.mxu1 %v2581_v41  ;;  %v2637_v41 = vld [vmem:[%s3414_s1 + $0x2f0] sm:$0xff]   ;;  %v2665_v13 = vld [vmem:[%s3414_s1 + $0x3e8] sm:$0xff]  }
  0x23   :  { %1639 = vmatmul.mubr.bf16.vlgmr.msra.gmra.mrb[0].mxu0 %v39_v37  ;;  %v2633_v37 = vld [vmem:[%s3414_s1 + $0x2e8] sm:$0xff]  }
  0x24   :  { %1679 = vmatmul.mubr.bf16.vlgmr.msra.gmra.mrb[0].mxu1 %v41_v39  ;;  %2329 = vmatpush3.bf16.msra.mxu0 %v2582_v42  ;;  %v2635_v39 = vld [vmem:[%s3414_s1 + $0x2a8] sm:$0xff]   ;;  %v2638_v42 = vld [vmem:[%s3414_s1 + $0x230] sm:$0xff]  }
  0x25   :  { %2351 = vmatpush3.bf16.msra.mxu1 %v2583_v43  ;;  %2330 = vmatprep.subr.bf16.mxu0 %v2584_v44  ;;  %v2639_v43 = vld [vmem:[%s3414_s1 + $0x2b0] sm:$0xff]   ;;  %v2640_v44 = vld [vmem:[%s3414_s1 + $0x278] sm:$0xff]  }
  0x26   :  { %2352 = vmatprep.subr.bf16.mxu1 %v2585_v45  ;;  %1718 = vmatprep.mubr.bf16.mxu0 %v44_v10  ;;  %v2641_v45 = vld [vmem:[%s3414_s1 + $0x2f8] sm:$0xff]   ;;  %v2662_v10 = vld [vmem:[%s3414_s1 + $0x320] sm:$0xff]  }
  0x27   :  { %1758 = vmatprep.mubr.bf16.mxu1 %v46_v11  ;;  %v2663_v11 = vld [vmem:[%s3414_s1 + $0x3a0] sm:$0xff]  }
  0x28   :  { %2331 = vmatpush3.bf16.msra.mxu0 %v2586_v46  ;;  %v2642_v46 = vld [vmem:[%s3414_s1 + $0x238] sm:$0xff]  }
  0x29   :  { %2353 = vmatpush3.bf16.msra.mxu1 %v2587_v47  ;;  %2332 = vmatprep.subr.bf16.mxu0 %v2588_v48  ;;  %v2643_v47 = vld [vmem:[%s3414_s1 + $0x2b8] sm:$0xff]   ;;  %v24_v48 = vld [vmem:[%s3415_s0 + $0x48] sm:$0xff] }
  0x2a   :  { %2354 = vmatprep.subr.bf16.mxu1 %v2589_v49  ;;  %v48_v49 = vpack.c.bf16 %v24_v48, %v24_v48  ;;  %v2692_v48 = vld [vmem:[%s3414_s1 + $0x460] sm:$0xff]  }
  0x2c   :  { %2333 = vmatpush3.bf16.msra.mxu0 %v2590_v50  ;;  %v26_v50 = vld [vmem:[%s3415_s0 + $0x58] sm:$0xff] }
  0x2d   :  { %2355 = vmatpush3.bf16.msra.mxu1 %v2591_v51  ;;  %2334 = vmatprep.subr.bf16.mxu0 %v2592_v52  ;;  %v23_v51 = vld [vmem:[%s3415_s0 + $0x40] sm:$0xff]  ;;  %v25_v52 = vld [vmem:[%s3415_s0 + $0x50] sm:$0xff] }
  0x2e   :  { %2356 = vmatprep.subr.bf16.mxu1 %v2593_v53  ;;  %v50_v53 = vpack.c.bf16 %v26_v50, %v26_v50  ;;  %v2694_v50 = vld [vmem:[%s3414_s1 + $0x420] sm:$0xff]  }
  0x30   :  { %2335 = vmatpush3.bf16.msra.mxu0 %v2594_v54  ;;  %v47_v54 = vpack.c.bf16 %v23_v51, %v23_v51  ;;  %v2695_v51 = vld [vmem:[%s3414_s1 + $0x4a0] sm:$0xff]  }
  0x31   :  { %2357 = vmatpush3.bf16.msra.mxu1 %v2595_v55  ;;  %2336 = vmatprep.subr.bf16.mxu0 %v2596_v56  ;;  %v49_v55 = vpack.c.bf16 %v25_v52, %v25_v52  ;;  %v2644_v56 = vld [vmem:[%s3414_s1 + $0x340] sm:$0xff]   ;;  %v2696_v52 = vld [vmem:[%s3414_s1 + $0x468] sm:$0xff]  }
  0x32   :  { %2358 = vmatprep.subr.bf16.mxu1 %v2597_v57  ;;  %v2645_v57 = vld [vmem:[%s3414_s1 + $0x3c0] sm:$0xff]  }
  0x34   :  { %2337 = vmatpush3.bf16.msra.mxu0 %v2598_v58  ;;  %v2646_v58 = vld [vmem:[%s3414_s1 + $0x300] sm:$0xff]  }
  0x35   :  { %2359 = vmatpush3.bf16.msra.mxu1 %v2599_v59  ;;  %2338 = vmatprep.subr.bf16.mxu0 %v2600_v60  ;;  %v2647_v59 = vld [vmem:[%s3414_s1 + $0x380] sm:$0xff]   ;;  %v2648_v60 = vld [vmem:[%s3414_s1 + $0x348] sm:$0xff]  }
  0x36   :  { %2360 = vmatprep.subr.bf16.mxu1 %v2601_v61  ;;  %v2649_v61 = vld [vmem:[%s3414_s1 + $0x3c8] sm:$0xff]  }
  0x38   :  { %2339 = vmatpush3.bf16.msra.mxu0 %v2602_v62  ;;  %v2650_v62 = vld [vmem:[%s3414_s1 + $0x308] sm:$0xff]  }
  0x39   :  { %2361 = vmatpush3.bf16.msra.mxu1 %v2603_v63  ;;  %2340 = vmatprep.subr.bf16.mxu0 %v2604_v0  ;;  %v2651_v63 = vld [vmem:[%s3414_s1 + $0x388] sm:$0xff]   ;;  %v2652_v0 = vld [vmem:[%s3414_s1 + $0x350] sm:$0xff]  }
  0x3a   :  { %2362 = vmatprep.subr.bf16.mxu1 %v2605_v1  ;;  %v2653_v1 = vld [vmem:[%s3414_s1 + $0x3d0] sm:$0xff]  }
  0x3c   :  { %2341 = vmatpush3.bf16.msra.mxu0 %v2606_v2  ;;  %v2654_v2 = vld [vmem:[%s3414_s1 + $0x310] sm:$0xff]  }
  0x3d   :  { %2363 = vmatpush3.bf16.msra.mxu1 %v2607_v3  ;;  %2342 = vmatprep.subr.bf16.mxu0 %v2608_v4  ;;  %v2655_v3 = vld [vmem:[%s3414_s1 + $0x390] sm:$0xff]   ;;  %v2656_v4 = vld [vmem:[%s3414_s1 + $0x358] sm:$0xff]  }
  0x3e   :  { %2364 = vmatprep.subr.bf16.mxu1 %v2609_v5  ;;  %v2657_v5 = vld [vmem:[%s3414_s1 + $0x3d8] sm:$0xff]  }
  0x40   :  { %2343 = vmatpush3.bf16.msra.mxu0 %v2610_v6  ;;  %v2658_v6 = vld [vmem:[%s3414_s1 + $0x318] sm:$0xff]  }
  0x41   :  { %2365 = vmatpush3.bf16.msra.mxu1 %v2611_v7  ;;  %2372 = vmatprep.subr.bf16.mxu0 %v2612_v16  ;;  %v2659_v7 = vld [vmem:[%s3414_s1 + $0x398] sm:$0xff]   ;;  %v2668_v16 = vld [vmem:[%s3414_s1 + $0x370] sm:$0xff]  }
  0x42   :  { %2394 = vmatprep.subr.bf16.mxu1 %v2613_v17  ;;  %v2669_v17 = vld [vmem:[%s3414_s1 + $0x3f0] sm:$0xff]  }
  0x43   :  { %1719 = vmatmul.mubr.bf16.vlgmr.msra.gmra.mrb[4].mxu0 %v43_v14  ;;  %v2666_v14 = vld [vmem:[%s3414_s1 + $0x328] sm:$0xff]  }
  0x44   :  { %1759 = vmatmul.mubr.bf16.vlgmr.msra.gmra.mrb[4].mxu1 %v45_v15  ;;  %2373 = vmatpush3.bf16.msra.mxu0 %v2614_v18  ;;  %v2667_v15 = vld [vmem:[%s3414_s1 + $0x3a8] sm:$0xff]   ;;  %v2670_v18 = vld [vmem:[%s3414_s1 + $0x330] sm:$0xff]  }
  0x45   :  { %2395 = vmatpush3.bf16.msra.mxu1 %v2615_v19  ;;  %2374 = vmatprep.subr.bf16.mxu0 %v2616_v20  ;;  %v2671_v19 = vld [vmem:[%s3414_s1 + $0x3b0] sm:$0xff]   ;;  %v2672_v20 = vld [vmem:[%s3414_s1 + $0x378] sm:$0xff]  }
  0x46   :  { %2396 = vmatprep.subr.bf16.mxu1 %v2617_v21  ;;  %1798 = vmatprep.mubr.bf16.mxu0 %v48_v49  ;;  %v2673_v21 = vld [vmem:[%s3414_s1 + $0x3f8] sm:$0xff]   ;;  %v2693_v49 = vld [vmem:[%s3414_s1 + $0x4e0] sm:$0xff]  }
  0x47   :  { %1838 = vmatprep.mubr.bf16.mxu1 %v50_v53  ;;  %v2697_v53 = vld [vmem:[%s3414_s1 + $0x4e8] sm:$0xff]  }
  0x48   :  { %2375 = vmatpush3.bf16.msra.mxu0 %v2618_v22  ;;  %v2674_v22 = vld [vmem:[%s3414_s1 + $0x338] sm:$0xff]  }
  0x49   :  { %2397 = vmatpush3.bf16.msra.mxu1 %v2619_v23  ;;  %2376 = vmatprep.subr.bf16.mxu0 %v2620_v24  ;;  %v2675_v23 = vld [vmem:[%s3414_s1 + $0x3b8] sm:$0xff]   ;;  %v28_v24 = vld [vmem:[%s3415_s0 + $0x68] sm:$0xff] }
  0x4a   :  { %2398 = vmatprep.subr.bf16.mxu1 %v2621_v25  ;;  %v30_v25 = vld [vmem:[%s3415_s0 + $0x78] sm:$0xff] }
  0x4c   :  { %2377 = vmatpush3.bf16.msra.mxu0 %v2622_v26  ;;  %v27_v26 = vld [vmem:[%s3415_s0 + $0x60] sm:$0xff] }
  0x4d   :  { %2399 = vmatpush3.bf16.msra.mxu1 %v2623_v27  ;;  %2378 = vmatprep.subr.bf16.mxu0 %v2624_v28  ;;  %v52_v27 = vpack.c.bf16 %v28_v24, %v28_v24  ;;  %v54_v28 = vpack.c.bf16 %v30_v25, %v30_v25  ;;  %v2724_v24 = vld [vmem:[%s3414_s1 + $0x560] sm:$0xff]  }
  0x4e   :  { %2400 = vmatprep.subr.bf16.mxu1 %v2625_v29  ;;  %v51_v29 = vpack.c.bf16 %v27_v26, %v27_v26  ;;  %v2725_v25 = vld [vmem:[%s3414_s1 + $0x5e0] sm:$0xff]  }
  0x4f   :  { %v2726_v26 = vld [vmem:[%s3414_s1 + $0x520] sm:$0xff]  }
  0x50   :  { %2379 = vmatpush3.bf16.msra.mxu0 %v2626_v30  ;;  %v29_v30 = vld [vmem:[%s3415_s0 + $0x70] sm:$0xff] }
  0x51   :  { %2401 = vmatpush3.bf16.msra.mxu1 %v2627_v31  ;;  %2380 = vmatprep.subr.bf16.mxu0 %v2628_v32  ;;  %v53_v31 = vpack.c.bf16 %v29_v30, %v29_v30  ;;  %v2676_v32 = vld [vmem:[%s3414_s1 + $0x440] sm:$0xff]   ;;  %v2730_v30 = vld [vmem:[%s3414_s1 + $0x528] sm:$0xff]  }
  0x52   :  { %2402 = vmatprep.subr.bf16.mxu1 %v2629_v33  ;;  %v2677_v33 = vld [vmem:[%s3414_s1 + $0x4c0] sm:$0xff]  }
  0x54   :  { %2381 = vmatpush3.bf16.msra.mxu0 %v2630_v34  ;;  %v2678_v34 = vld [vmem:[%s3414_s1 + $0x400] sm:$0xff]  }
  0x55   :  { %2403 = vmatpush3.bf16.msra.mxu1 %v2631_v35  ;;  %2382 = vmatprep.subr.bf16.mxu0 %v2632_v36  ;;  %v2679_v35 = vld [vmem:[%s3414_s1 + $0x480] sm:$0xff]   ;;  %v2680_v36 = vld [vmem:[%s3414_s1 + $0x448] sm:$0xff]  }
  0x56   :  { %2404 = vmatprep.subr.bf16.mxu1 %v2633_v37  ;;  %v2681_v37 = vld [vmem:[%s3414_s1 + $0x4c8] sm:$0xff]  }
  0x58   :  { %2383 = vmatpush3.bf16.msra.mxu0 %v2634_v38  ;;  %v2682_v38 = vld [vmem:[%s3414_s1 + $0x408] sm:$0xff]  }
  0x59   :  { %2405 = vmatpush3.bf16.msra.mxu1 %v2635_v39  ;;  %2384 = vmatprep.subr.bf16.mxu0 %v2636_v40  ;;  %v2683_v39 = vld [vmem:[%s3414_s1 + $0x488] sm:$0xff]   ;;  %v2684_v40 = vld [vmem:[%s3414_s1 + $0x450] sm:$0xff]  }
  0x5a   :  { %2406 = vmatprep.subr.bf16.mxu1 %v2637_v41  ;;  %v2685_v41 = vld [vmem:[%s3414_s1 + $0x4d0] sm:$0xff]  }
  0x5c   :  { %2385 = vmatpush3.bf16.msra.mxu0 %v2638_v42  ;;  %v2686_v42 = vld [vmem:[%s3414_s1 + $0x410] sm:$0xff]  }
  0x5d   :  { %2407 = vmatpush3.bf16.msra.mxu1 %v2639_v43  ;;  %2386 = vmatprep.subr.bf16.mxu0 %v2640_v44  ;;  %v2687_v43 = vld [vmem:[%s3414_s1 + $0x490] sm:$0xff]   ;;  %v2688_v44 = vld [vmem:[%s3414_s1 + $0x458] sm:$0xff]  }
  0x5e   :  { %2408 = vmatprep.subr.bf16.mxu1 %v2641_v45  ;;  %v2689_v45 = vld [vmem:[%s3414_s1 + $0x4d8] sm:$0xff]  }
  0x60   :  { %2387 = vmatpush3.bf16.msra.mxu0 %v2642_v46  ;;  %v2690_v46 = vld [vmem:[%s3414_s1 + $0x418] sm:$0xff]  }
  0x61   :  { %2409 = vmatpush3.bf16.msra.mxu1 %v2643_v47  ;;  %2416 = vmatprep.subr.bf16.mxu0 %v2644_v56  ;;  %v2691_v47 = vld [vmem:[%s3414_s1 + $0x498] sm:$0xff]   ;;  %v2700_v56 = vld [vmem:[%s3414_s1 + $0x470] sm:$0xff]  }
  0x62   :  { %2438 = vmatprep.subr.bf16.mxu1 %v2645_v57  ;;  %v2701_v57 = vld [vmem:[%s3414_s1 + $0x4f0] sm:$0xff]  }
  0x63   :  { %1799 = vmatmul.mubr.bf16.vlgmr.msra.gmra.mrb[8].mxu0 %v47_v54  ;;  %v2698_v54 = vld [vmem:[%s3414_s1 + $0x428] sm:$0xff]  }
  0x64   :  { %1839 = vmatmul.mubr.bf16.vlgmr.msra.gmra.mrb[8].mxu1 %v49_v55  ;;  %2417 = vmatpush3.bf16.msra.mxu0 %v2646_v58  ;;  %v2699_v55 = vld [vmem:[%s3414_s1 + $0x4a8] sm:$0xff]   ;;  %v2702_v58 = vld [vmem:[%s3414_s1 + $0x430] sm:$0xff]  }
  0x65   :  { %2439 = vmatpush3.bf16.msra.mxu1 %v2647_v59  ;;  %2418 = vmatprep.subr.bf16.mxu0 %v2648_v60  ;;  %v2703_v59 = vld [vmem:[%s3414_s1 + $0x4b0] sm:$0xff]   ;;  %v2704_v60 = vld [vmem:[%s3414_s1 + $0x478] sm:$0xff]  }
  0x66   :  { %2440 = vmatprep.subr.bf16.mxu1 %v2649_v61  ;;  %1878 = vmatprep.mubr.bf16.mxu0 %v52_v27  ;;  %v2705_v61 = vld [vmem:[%s3414_s1 + $0x4f8] sm:$0xff]   ;;  %v2727_v27 = vld [vmem:[%s3414_s1 + $0x5a0] sm:$0xff]  }
  0x67   :  { %1918 = vmatprep.mubr.bf16.mxu1 %v54_v28  ;;  %v2728_v28 = vld [vmem:[%s3414_s1 + $0x568] sm:$0xff]  }
  0x68   :  { %2419 = vmatpush3.bf16.msra.mxu0 %v2650_v62  ;;  %v2706_v62 = vld [vmem:[%s3414_s1 + $0x438] sm:$0xff]  }
  0x69   :  { %2441 = vmatpush3.bf16.msra.mxu1 %v2651_v63  ;;  %2420 = vmatprep.subr.bf16.mxu0 %v2652_v0  ;;  %v2707_v63 = vld [vmem:[%s3414_s1 + $0x4b8] sm:$0xff]   ;;  %v32_v0 = vld [vmem:[%s3415_s0 + $0x88] sm:$0xff] }
  0x6a   :  { %2442 = vmatprep.subr.bf16.mxu1 %v2653_v1  ;;  %v34_v1 = vld [vmem:[%s3415_s0 + $0x98] sm:$0xff] }
  0x6c   :  { %2421 = vmatpush3.bf16.msra.mxu0 %v2654_v2  ;;  %v56_v2 = vpack.c.bf16 %v32_v0, %v32_v0 }
  0x6d   :  { %2443 = vmatpush3.bf16.msra.mxu1 %v2655_v3  ;;  %2422 = vmatprep.subr.bf16.mxu0 %v2656_v4  ;;  %v58_v3 = vpack.c.bf16 %v34_v1, %v34_v1  ;;  %v31_v4 = vld [vmem:[%s3415_s0 + $0x80] sm:$0xff] }
  0x6e   :  { %2444 = vmatprep.subr.bf16.mxu1 %v2657_v5  ;;  %v33_v5 = vld [vmem:[%s3415_s0 + $0x90] sm:$0xff] }
  0x70   :  { %2423 = vmatpush3.bf16.msra.mxu0 %v2658_v6  ;;  %v55_v6 = vpack.c.bf16 %v31_v4, %v31_v4 }
  0x71   :  { %2445 = vmatpush3.bf16.msra.mxu1 %v2659_v7  ;;  %2424 = vmatprep.subr.bf16.mxu0 %v2660_v8  ;;  %v57_v7 = vpack.c.bf16 %v33_v5, %v33_v5  ;;  %v2708_v8 = vld [vmem:[%s3414_s1 + $0x540] sm:$0xff]  }
  0x72   :  { %2446 = vmatprep.subr.bf16.mxu1 %v2661_v9  ;;  %v2709_v9 = vld [vmem:[%s3414_s1 + $0x5c0] sm:$0xff]  }
  0x74   :  { %2425 = vmatpush3.bf16.msra.mxu0 %v2662_v10  ;;  %v2710_v10 = vld [vmem:[%s3414_s1 + $0x500] sm:$0xff]  }
  0x75   :  { %2447 = vmatpush3.bf16.msra.mxu1 %v2663_v11  ;;  %2426 = vmatprep.subr.bf16.mxu0 %v2664_v12  ;;  %v2711_v11 = vld [vmem:[%s3414_s1 + $0x580] sm:$0xff]   ;;  %v2712_v12 = vld [vmem:[%s3414_s1 + $0x548] sm:$0xff]  }
  0x76   :  { %2448 = vmatprep.subr.bf16.mxu1 %v2665_v13  ;;  %v2713_v13 = vld [vmem:[%s3414_s1 + $0x5c8] sm:$0xff]  }
  0x78   :  { %2427 = vmatpush3.bf16.msra.mxu0 %v2666_v14  ;;  %v2714_v14 = vld [vmem:[%s3414_s1 + $0x508] sm:$0xff]  }
  0x79   :  { %2449 = vmatpush3.bf16.msra.mxu1 %v2667_v15  ;;  %2428 = vmatprep.subr.bf16.mxu0 %v2668_v16  ;;  %v2715_v15 = vld [vmem:[%s3414_s1 + $0x588] sm:$0xff]   ;;  %v2716_v16 = vld [vmem:[%s3414_s1 + $0x550] sm:$0xff]  }
  0x7a   :  { %2450 = vmatprep.subr.bf16.mxu1 %v2669_v17  ;;  %v2717_v17 = vld [vmem:[%s3414_s1 + $0x5d0] sm:$0xff]  }
  0x7c   :  { %2429 = vmatpush3.bf16.msra.mxu0 %v2670_v18  ;;  %v2718_v18 = vld [vmem:[%s3414_s1 + $0x510] sm:$0xff]  }
  0x7d   :  { %2451 = vmatpush3.bf16.msra.mxu1 %v2671_v19  ;;  %2430 = vmatprep.subr.bf16.mxu0 %v2672_v20  ;;  %v2719_v19 = vld [vmem:[%s3414_s1 + $0x590] sm:$0xff]   ;;  %v2720_v20 = vld [vmem:[%s3414_s1 + $0x558] sm:$0xff]  }
  0x7e   :  { %2452 = vmatprep.subr.bf16.mxu1 %v2673_v21  ;;  %v2721_v21 = vld [vmem:[%s3414_s1 + $0x5d8] sm:$0xff]  }
  0x80   :  { %2431 = vmatpush3.bf16.msra.mxu0 %v2674_v22  ;;  %v2722_v22 = vld [vmem:[%s3414_s1 + $0x518] sm:$0xff]  }
  0x81   :  { %2453 = vmatpush3.bf16.msra.mxu1 %v2675_v23  ;;  %2460 = vmatprep.subr.bf16.mxu0 %v2676_v32  ;;  %v2723_v23 = vld [vmem:[%s3414_s1 + $0x598] sm:$0xff]   ;;  %v2732_v32 = vld [vmem:[%s3414_s1 + $0x570] sm:$0xff]  }
  0x82   :  { %2482 = vmatprep.subr.bf16.mxu1 %v2677_v33  ;;  %v2733_v33 = vld [vmem:[%s3414_s1 + $0x5f0] sm:$0xff]  }
  0x83   :  { %1879 = vmatmul.mubr.bf16.vlgmr.msra.gmra.mrb[12].mxu0 %v51_v29  ;;  %v2729_v29 = vld [vmem:[%s3414_s1 + $0x5e8] sm:$0xff]  }
  0x84   :  { %1919 = vmatmul.mubr.bf16.vlgmr.msra.gmra.mrb[12].mxu1 %v53_v31  ;;  %2461 = vmatpush3.bf16.msra.mxu0 %v2678_v34  ;;  %v2731_v31 = vld [vmem:[%s3414_s1 + $0x5a8] sm:$0xff]   ;;  %v2734_v34 = vld [vmem:[%s3414_s1 + $0x530] sm:$0xff]  }
  0x85   :  { %2483 = vmatpush3.bf16.msra.mxu1 %v2679_v35  ;;  %2462 = vmatprep.subr.bf16.mxu0 %v2680_v36  ;;  %v2735_v35 = vld [vmem:[%s3414_s1 + $0x5b0] sm:$0xff]   ;;  %v2736_v36 = vld [vmem:[%s3414_s1 + $0x578] sm:$0xff]  }
  0x86   :  { %2484 = vmatprep.subr.bf16.mxu1 %v2681_v37  ;;  %1958 = vmatprep.mubr.bf16.mxu0 %v56_v2  ;;  %v2737_v37 = vld [vmem:[%s3414_s1 + $0x5f8] sm:$0xff]  }
  0x87   :  { %1998 = vmatprep.mubr.bf16.mxu1 %v58_v3 }
  0x88   :  { %2463 = vmatpush3.bf16.msra.mxu0 %v2682_v38  ;;  %v2738_v38 = vld [vmem:[%s3414_s1 + $0x538] sm:$0xff]  }
  0x89   :  { %2485 = vmatpush3.bf16.msra.mxu1 %v2683_v39  ;;  %2464 = vmatprep.subr.bf16.mxu0 %v2684_v40  ;;  %v2739_v39 = vld [vmem:[%s3414_s1 + $0x5b8] sm:$0xff]   ;;  %v36_v40 = vld [vmem:[%s3415_s0 + $0xa8] sm:$0xff] }
  0x8a   :  { %2486 = vmatprep.subr.bf16.mxu1 %v2685_v41  ;;  %v60_v41 = vpack.c.bf16 %v36_v40, %v36_v40 }
  0x8c   :  { %2465 = vmatpush3.bf16.msra.mxu0 %v2686_v42  ;;  %v38_v42 = vld [vmem:[%s3415_s0 + $0xb8] sm:$0xff] }
  0x8d   :  { %2487 = vmatpush3.bf16.msra.mxu1 %v2687_v43  ;;  %2466 = vmatprep.subr.bf16.mxu0 %v2688_v44  ;;  %v35_v43 = vld [vmem:[%s3415_s0 + $0xa0] sm:$0xff]  ;;  %v37_v44 = vld [vmem:[%s3415_s0 + $0xb0] sm:$0xff] }
  0x8e   :  { %2488 = vmatprep.subr.bf16.mxu1 %v2689_v45  ;;  %v62_v45 = vpack.c.bf16 %v38_v42, %v38_v42 }
  0x90   :  { %2467 = vmatpush3.bf16.msra.mxu0 %v2690_v46  ;;  %v59_v46 = vpack.c.bf16 %v35_v43, %v35_v43 }
  0x91   :  { %2489 = vmatpush3.bf16.msra.mxu1 %v2691_v47  ;;  %2468 = vmatprep.subr.bf16.mxu0 %v2692_v48  ;;  %v61_v47 = vpack.c.bf16 %v37_v44, %v37_v44 }
  0x92   :  { %2490 = vmatprep.subr.bf16.mxu1 %v2693_v49 }
  0x94   :  { %2469 = vmatpush3.bf16.msra.mxu0 %v2694_v50  ;;  %v2091_v50 = vld [vmem:[%s3416_s2] ss:$0 sm:$0xff] }
  0x95   :  { %2491 = vmatpush3.bf16.msra.mxu1 %v2695_v51  ;;  %2470 = vmatprep.subr.bf16.mxu0 %v2696_v52 }
  0x96   :  { %2492 = vmatprep.subr.bf16.mxu1 %v2697_v53 }
  0x98   :  { %2471 = vmatpush3.bf16.msra.mxu0 %v2698_v54 }
  0x99   :  { %2493 = vmatpush3.bf16.msra.mxu1 %v2699_v55  ;;  %2472 = vmatprep.subr.bf16.mxu0 %v2700_v56 }
  0x9a   :  { %2494 = vmatprep.subr.bf16.mxu1 %v2701_v57 }
  0x9c   :  { %2473 = vmatpush3.bf16.msra.mxu0 %v2702_v58 }
  0x9d   :  { %2495 = vmatpush3.bf16.msra.mxu1 %v2703_v59  ;;  %2474 = vmatprep.subr.bf16.mxu0 %v2704_v60 }
  0x9e   :  { %2496 = vmatprep.subr.bf16.mxu1 %v2705_v61 }
  0xa0   :  { %2475 = vmatpush3.bf16.msra.mxu0 %v2706_v62 }
  0xa1   :  { %2497 = vmatpush3.bf16.msra.mxu1 %v2707_v63  ;;  %2504 = vmatprep.subr.bf16.mxu0 %v2708_v8 }
  0xa2   :  { %2526 = vmatprep.subr.bf16.mxu1 %v2709_v9 }
  0xa3   :  { %1959 = vmatmul.mubr.bf16.vlgmr.msra.gmra.mrb[16].mxu0 %v55_v6 }
  0xa4   :  { %1999 = vmatmul.mubr.bf16.vlgmr.msra.gmra.mrb[16].mxu1 %v57_v7  ;;  %2505 = vmatpush3.bf16.msra.mxu0 %v2710_v10 }
  0xa5   :  { %2527 = vmatpush3.bf16.msra.mxu1 %v2711_v11  ;;  %2506 = vmatprep.subr.bf16.mxu0 %v2712_v12 }
  0xa6   :  { %2528 = vmatprep.subr.bf16.mxu1 %v2713_v13  ;;  %2038 = vmatprep.mubr.bf16.mxu0 %v60_v41 }
  0xa7   :  { %2078 = vmatprep.mubr.bf16.mxu1 %v62_v45 }
  0xa8   :  { %2507 = vmatpush3.bf16.msra.mxu0 %v2714_v14 }
  0xa9   :  { %2529 = vmatpush3.bf16.msra.mxu1 %v2715_v15  ;;  %2508 = vmatprep.subr.bf16.mxu0 %v2716_v16 }
  0xaa   :  { %2530 = vmatprep.subr.bf16.mxu1 %v2717_v17 }
  0xac   :  { %2509 = vmatpush3.bf16.msra.mxu0 %v2718_v18 }
  0xad   :  { %2531 = vmatpush3.bf16.msra.mxu1 %v2719_v19  ;;  %2510 = vmatprep.subr.bf16.mxu0 %v2720_v20 }
  0xae   :  { %2532 = vmatprep.subr.bf16.mxu1 %v2721_v21 }
  0xb0   :  { %2511 = vmatpush3.bf16.msra.mxu0 %v2722_v22 }
  0xb1   :  { %2533 = vmatpush3.bf16.msra.mxu1 %v2723_v23  ;;  %2512 = vmatprep.subr.bf16.mxu0 %v2724_v24 }
  0xb2   :  { %2534 = vmatprep.subr.bf16.mxu1 %v2725_v25 }
  0xb4   :  { %2513 = vmatpush3.bf16.msra.mxu0 %v2726_v26 }
  0xb5   :  { %2535 = vmatpush3.bf16.msra.mxu1 %v2727_v27  ;;  %2514 = vmatprep.subr.bf16.mxu0 %v2728_v28 }
  0xb6   :  { %2536 = vmatprep.subr.bf16.mxu1 %v2729_v29 }
  0xb8   :  { %2515 = vmatpush3.bf16.msra.mxu0 %v2730_v30 }
  0xb9   :  { %2537 = vmatpush3.bf16.msra.mxu1 %v2731_v31  ;;  %2516 = vmatprep.subr.bf16.mxu0 %v2732_v32 }
  0xba   :  { %2538 = vmatprep.subr.bf16.mxu1 %v2733_v33 }
  0xbc   :  { %2517 = vmatpush3.bf16.msra.mxu0 %v2734_v34 }
  0xbd   :  { %2539 = vmatpush3.bf16.msra.mxu1 %v2735_v35  ;;  %2518 = vmatprep.subr.bf16.mxu0 %v2736_v36 }
  0xbe   :  { %2540 = vmatprep.subr.bf16.mxu1 %v2737_v37 }
  0xc0   :  { %2519 = vmatpush3.bf16.msra.mxu0 %v2738_v38 }
  0xc1   :  { %2541 = vmatpush3.bf16.msra.mxu1 %v2739_v39 }
  0xc3   :  { %2039 = vmatmul.mubr.bf16.vlgmr.msra.gmra.mrb[20].mxu0 %v59_v46 }
  0xc4   :  { %2079 = vmatmul.mubr.bf16.vlgmr.msra.gmra.mrb[20].mxu1 %v61_v47 }
  0xf6   :  { %v2300_v48 = vpop.f32.mrb[0].mxu0 }
  0xf7   :  { %v2322_v49 = vpop.f32.mrb[0].mxu1  ;;  %v2301_v51 = vpop.f32.mrb[1].mxu0 }
  0xf8   :  { %v2323_v52 = vpop.f32.mrb[1].mxu1  ;;  %v2302_v53 = vadd.f32 %v2301_v51, %v2300_v48  ;;  %v2303_v55 = vpop.f32.mrb[2].mxu0 }
  0xf9   :  { %v2324_v54 = vadd.f32 %v2323_v52, %v2322_v49  ;;  %v2325_v56 = vpop.f32.mrb[2].mxu1  ;;  %v2304_v57 = vpop.f32.mrb[3].mxu0 }
  0xfa   :  { %v2326_v58 = vpop.f32.mrb[3].mxu1  ;;  %v1641_v59 = vadd.f32 %v2302_v53, %v2091_v50 }
  0xfc   :  { %v1681_v60 = vadd.f32 %v2324_v54, %v1641_v59 }
 0x116   :  { %v2344_v61 = vpop.f32.mrb[4].mxu0 }
 0x117   :  { %v2366_v62 = vpop.f32.mrb[4].mxu1  ;;  %v2345_v63 = vpop.f32.mrb[5].mxu0 }
 0x118   :  { %v2346_v0 = vadd.f32 %v2345_v63, %v2344_v61  ;;  %v2367_v1 = vpop.f32.mrb[5].mxu1  ;;  %v2347_v2 = vpop.f32.mrb[6].mxu0 }
 0x119   :  { %v2368_v3 = vadd.f32 %v2367_v1, %v2366_v62  ;;  %v2369_v4 = vpop.f32.mrb[6].mxu1  ;;  %v2348_v5 = vpop.f32.mrb[7].mxu0 }
 0x11a   :  { %v1721_v6 = vadd.f32 %v2346_v0, %v1681_v60  ;;  %v2370_v7 = vpop.f32.mrb[7].mxu1 }
 0x11c   :  { %v1761_v8 = vadd.f32 %v2368_v3, %v1721_v6 }
 0x136   :  { %v2388_v9 = vpop.f32.mrb[8].mxu0 }
 0x137   :  { %v2410_v10 = vpop.f32.mrb[8].mxu1  ;;  %v2389_v11 = vpop.f32.mrb[9].mxu0 }
 0x138   :  { %v2390_v12 = vadd.f32 %v2389_v11, %v2388_v9  ;;  %v2411_v13 = vpop.f32.mrb[9].mxu1  ;;  %v2391_v14 = vpop.f32.mrb[10].mxu0 }
 0x139   :  { %v2412_v15 = vadd.f32 %v2411_v13, %v2410_v10  ;;  %v2413_v16 = vpop.f32.mrb[10].mxu1  ;;  %v2392_v17 = vpop.f32.mrb[11].mxu0 }
 0x13a   :  { %v1801_v18 = vadd.f32 %v2390_v12, %v1761_v8  ;;  %v2414_v19 = vpop.f32.mrb[11].mxu1 }
 0x13c   :  { %v1841_v20 = vadd.f32 %v2412_v15, %v1801_v18 }
 0x156   :  { %v2432_v21 = vpop.f32.mrb[12].mxu0 }
 0x157   :  { %v2454_v22 = vpop.f32.mrb[12].mxu1  ;;  %v2433_v23 = vpop.f32.mrb[13].mxu0 }
 0x158   :  { %v2455_v24 = vpop.f32.mrb[13].mxu1  ;;  %v2434_v25 = vadd.f32 %v2433_v23, %v2432_v21  ;;  %v2435_v27 = vpop.f32.mrb[14].mxu0 }
 0x159   :  { %v2456_v26 = vadd.f32 %v2455_v24, %v2454_v22  ;;  %v2457_v28 = vpop.f32.mrb[14].mxu1  ;;  %v2436_v29 = vpop.f32.mrb[15].mxu0 }
 0x15a   :  { %v2458_v30 = vpop.f32.mrb[15].mxu1  ;;  %v1881_v31 = vadd.f32 %v2434_v25, %v1841_v20 }
 0x15c   :  { %v1921_v32 = vadd.f32 %v2456_v26, %v1881_v31 }
 0x176   :  { %v2476_v33 = vpop.f32.mrb[16].mxu0 }
 0x177   :  { %v2498_v34 = vpop.f32.mrb[16].mxu1  ;;  %v2477_v35 = vpop.f32.mrb[17].mxu0 }
 0x178   :  { %v2478_v36 = vadd.f32 %v2477_v35, %v2476_v33  ;;  %v2499_v37 = vpop.f32.mrb[17].mxu1  ;;  %v2479_v38 = vpop.f32.mrb[18].mxu0 }
 0x179   :  { %v2500_v39 = vadd.f32 %v2499_v37, %v2498_v34  ;;  %v2501_v40 = vpop.f32.mrb[18].mxu1  ;;  %v2480_v41 = vpop.f32.mrb[19].mxu0 }
 0x17a   :  { %v1961_v42 = vadd.f32 %v2478_v36, %v1921_v32  ;;  %v2502_v43 = vpop.f32.mrb[19].mxu1 }
 0x17c   :  { %v2001_v44 = vadd.f32 %v2500_v39, %v1961_v42 }
 0x196   :  { %v2520_v45 = vpop.f32.mrb[20].mxu0 }
 0x197   :  { %v2542_v46 = vpop.f32.mrb[20].mxu1  ;;  %v2521_v47 = vpop.f32.mrb[21].mxu0 }
 0x198   :  { %v2522_v48 = vadd.f32 %v2521_v47, %v2520_v45  ;;  %v2543_v49 = vpop.f32.mrb[21].mxu1  ;;  %v2523_v50 = vpop.f32.mrb[22].mxu0 }
 0x199   :  { %v2544_v51 = vadd.f32 %v2543_v49, %v2542_v46  ;;  %v2545_v52 = vpop.f32.mrb[22].mxu1  ;;  %v2524_v53 = vpop.f32.mrb[23].mxu0 }
 0x19a   :  { %v2041_v54 = vadd.f32 %v2522_v48, %v2001_v44  ;;  %v2546_v55 = vpop.f32.mrb[23].mxu1 }
 0x19c   :  { %v2081_v56 = vadd.f32 %v2544_v51, %v2041_v54 }
 0x19e   :  { %2086 = vst [vmem:[%s3417_s3] sm:$0xff] %v2081_v56 }

// kernel: vit_linear_forward.15
= control target key start
LH: loop header
LB: loop body
LE: loop exit
PB: predicated region body
PF: predicated region fallthrough
CT: control target
= control target key end

     0   :  { %v198_v0 = vmov 0.0   ;;  %vm199_vm0 = vmmov 0   ;;  %s267_s1 = inlined_call_operand.vmem [shape: bf16[128,128], index: 1, kind: input, shape index: {}]   ;;  %s268_s0 = inlined_call_operand.vmem [shape: bf16[10,128], index: 0, kind: input, shape index: {}]   ;;  %s269_s2 = inlined_call_operand.vmem [shape: f32[1,128], index: 2, kind: input, shape index: {}]   ;;  %s270_s3 = inlined_call_operand.vmem [shape: f32[10,128], index: 3, kind: input, shape index: {}]   ;;  %s271_s4 = inlined_call_operand.vmem [shape: f32[10,128], index: 4, kind: output, shape index: {}]  }
   0x1   :  { %167 = vmatprep.subr.bf16.mxu0 %v198_v0  ;;  %v189_v1 = vld [vmem:[%s267_s1] sm:$0xff]   ;;  %183 = vmatprep.mubr.msk.bf16.mxu0 %vm199_vm0, %v198_v0  ;;  %v190_v2 = vld [vmem:[%s267_s1 + $0x8] sm:$0xff]   ;;  %v191_v3 = vld [vmem:[%s267_s1 + $0x10] sm:$0xff]  }
   0x2   :  { %168 = vmatpush3.bf16.msra.mxu0 %v189_v1  ;;  %v192_v4 = vld [vmem:[%s267_s1 + $0x18] sm:$0xff]   ;;  %v193_v5 = vld [vmem:[%s267_s1 + $0x20] sm:$0xff]   ;;  %v194_v6 = vld [vmem:[%s267_s1 + $0x28] sm:$0xff]  }
   0x3   :  { %169 = vmatprep.subr.bf16.mxu0 %v198_v0  ;;  %v195_v7 = vld [vmem:[%s267_s1 + $0x30] sm:$0xff]   ;;  %v196_v8 = vld [vmem:[%s267_s1 + $0x38] sm:$0xff]   ;;  %v197_v9 = vld [vmem:[%s268_s0] sm:$0x1f]  }
   0x4   :  { %v148_v10 = vld [vmem:[%s269_s2] ss:$0 sm:$0xff]  ;;  %v139_v16 = vld [vmem:[%s270_s3 + $0x8] sm:$0x3] }
   0x5   :  { %v138_v12 = vld [vmem:[%s270_s3] sm:$0xff] }
   0x6   :  { %170 = vmatpush3.bf16.msra.mxu0 %v190_v2 }
   0x7   :  { %171 = vmatprep.subr.bf16.mxu0 %v198_v0 }
   0xa   :  { %172 = vmatpush3.bf16.msra.mxu0 %v191_v3 }
   0xb   :  { %173 = vmatprep.subr.bf16.mxu0 %v198_v0 }
   0xe   :  { %174 = vmatpush3.bf16.msra.mxu0 %v192_v4 }
   0xf   :  { %175 = vmatprep.subr.bf16.mxu0 %v198_v0 }
  0x12   :  { %176 = vmatpush3.bf16.msra.mxu0 %v193_v5 }
  0x13   :  { %177 = vmatprep.subr.bf16.mxu0 %v198_v0 }
  0x16   :  { %178 = vmatpush3.bf16.msra.mxu0 %v194_v6 }
  0x17   :  { %179 = vmatprep.subr.bf16.mxu0 %v198_v0 }
  0x1a   :  { %180 = vmatpush3.bf16.msra.mxu0 %v195_v7 }
  0x1b   :  { %181 = vmatprep.subr.bf16.mxu0 %v198_v0 }
  0x1e   :  { %182 = vmatpush3.bf16.msra.mxu0 %v196_v8 }
  0x21   :  { %184 = vmatmul.mubr.bf16.vlgmr.msra.gmra.mrb[0].mxu0 %v197_v9 }
  0xf4   :  { %v131_v11 = vpop.f32.mrb[0].mxu0 }
  0xf5   :  { %v132_v13 = vadd.f32 %v148_v10, %v131_v11  ;;  %v185_v14 = vpop.f32.mrb[1].mxu0 }
  0xf6   :  { %v134_v15 = vpop.f32.mrb[2].mxu0 }
  0xf7   :  { %v140_v17 = vadd.f32 %v138_v12, %v132_v13  ;;  %v135_v18 = vadd.f32 %v148_v10, %v134_v15  ;;  %v186_v19 = vpop.f32.mrb[3].mxu0 }
  0xf9   :  { %142 = vst [vmem:[%s271_s4] sm:$0xff] %v140_v17  ;;  %v141_v20 = vadd.f32 %v139_v16, %v135_v18 }
  0xfb   :  { %143 = vst [vmem:[%s271_s4 + $0x8] sm:$0x3] %v141_v20 }

// kernel: vit_linear_forward.23
= control target key start
LH: loop header
LB: loop body
LE: loop exit
PB: predicated region body
PF: predicated region fallthrough
CT: control target
= control target key end

     0   :  { %vm23_vm0 = vcmask 1041408   ;;  %s341_s0 = inlined_call_operand.vmem [shape: f32[2,128], index: 0, kind: input, shape index: {}]   ;;  %s342_s1 = inlined_call_operand.vmem [shape: f32[1,128], index: 1, kind: input, shape index: {}]   ;;  %s343_s2 = inlined_call_operand.vmem [shape: f32[1,128], index: 2, kind: input, shape index: {}]   ;;  %s344_s3 = inlined_call_operand.vmem [shape: bf16[128,128], index: 3, kind: input, shape index: {}]   ;;  %s345_s4 = inlined_call_operand.vmem [shape: f32[1,128], index: 4, kind: input, shape index: {}]   ;;  %s346_s5 = inlined_call_operand.hbm [shape: f32[2,128], index: 5, kind: output, shape index: {}]  }
   0x1   :  { %v22_v0 = vld [vmem:[%s341_s0] sm:$0x3] }
   0x2   :  { %v24_v1 = vsel %vm23_vm0, %v22_v0, 0.0 }
   0x3   :  { %25 = vadd.xlane.f32.xlu0 %v24_v1 }
   0x4   :  { %10 = vsyncpa [#allocation3], 0  ;;  %v224_v2 = vld [vmem:[%s344_s3] sm:$0xff]   ;;  %v258_v3 = vmov 0.0   ;;  %v225_v4 = vld [vmem:[%s344_s3 + $0x8] sm:$0xff]   ;;  %vm259_vm1 = vmmov 0  }
   0x5   :  { %201 = vmatprep.subr.bf16.mxu0 %v258_v3  ;;  %v226_v10 = vld [vmem:[%s344_s3 + $0x10] sm:$0xff]   ;;  %v227_v11 = vld [vmem:[%s344_s3 + $0x18] sm:$0xff]   ;;  %v228_v12 = vld [vmem:[%s344_s3 + $0x20] sm:$0xff]   ;;  %217 = vmatprep.mubr.msk.bf16.mxu0 %vm259_vm1, %v258_v3  ;;  %s260_s15 = smov [#allocation2]  }
   0x6   :  { %202 = vmatpush3.bf16.msra.mxu0 %v224_v2  ;;  %v229_v13 = vld [vmem:[%s344_s3 + $0x28] sm:$0xff]   ;;  %v230_v14 = vld [vmem:[%s344_s3 + $0x30] sm:$0xff]   ;;  %v231_v15 = vld [vmem:[%s344_s3 + $0x38] sm:$0xff]   ;;  %s173_s16 = sshll.u32 %s260_s15, 4  ;;  %s174_s16 = int_to_ptr.vmem [resolvable:$true] %s173_s16 }
   0x7   :  { %203 = vmatprep.subr.bf16.mxu0 %v258_v3  ;;  %v181_v20 = vld [vmem:[%s342_s1] ss:$0 sm:$0xff]  ;;  %s234_s1 = scalar_lea.vmem %s174_s16, 32  ;;  %p239_p1 = scmp.lt.s32.totalorder %s174_s16, %s174_s16 }
   0x8   :  { %v182_v22 = vld [vmem:[%s343_s2] ss:$0 sm:$0xff]  ;;  %p235_p0 = scmp.ne.s32.totalorder %s174_s16, %s234_s1  ;;  %p240_p2 = scmp.lt.s32.totalorder %s234_s1, %s234_s1 }
   0x9   :  { %v183_v26 = vld [vmem:[%s345_s4] ss:$0 sm:$0xff] }
   0xa   :  { %204 = vmatpush3.bf16.msra.mxu0 %v225_v4  ;;  %p241_p3 = por %p240_p2, %p239_p1 }
   0xb   :  { %205 = vmatprep.subr.bf16.mxu0 %v258_v3 }
   0xc   :  { %p242_p4 = pnand %p241_p3, %p235_p0 }
   0xe   :  { %206 = vmatpush3.bf16.msra.mxu0 %v226_v10 }
   0xf   :  { %207 = vmatprep.subr.bf16.mxu0 %v258_v3 }
  0x12   :  { %208 = vmatpush3.bf16.msra.mxu0 %v227_v11 }
  0x13   :  { %209 = vmatprep.subr.bf16.mxu0 %v258_v3 }
  0x16   :  { %210 = vmatpush3.bf16.msra.mxu0 %v228_v12 }
  0x17   :  { %211 = vmatprep.subr.bf16.mxu0 %v258_v3 }
  0x1a   :  { %212 = vmatpush3.bf16.msra.mxu0 %v229_v13 }
  0x1b   :  { %213 = vmatprep.subr.bf16.mxu0 %v258_v3 }
  0x1e   :  { %214 = vmatpush3.bf16.msra.mxu0 %v230_v14 }
  0x1f   :  { %215 = vmatprep.subr.bf16.mxu0 %v258_v3 }
  0x22   :  { %216 = vmatpush3.bf16.msra.mxu0 %v231_v15 }
  0x90   :  { %v26_v5 = vpop.xlane.xlu0 %25 }
  0x91   :  { %v28_v6 = vmul.f32 0.0078125, %v26_v5 }
  0x93   :  { %v29_v7 = vsub.f32 %v22_v0, %v28_v6 }
  0x95   :  { %v30_v8 = vmul.f32 %v29_v7, %v29_v7 }
  0x97   :  { %v31_v9 = vsel %vm23_vm0, %v30_v8, 0.0 }
  0x98   :  { %32 = vadd.xlane.f32.xlu0 %v31_v9 }
 0x125   :  { %v33_v16 = vpop.xlane.xlu0 %32 }
 0x126   :  { %v34_v17 = vmul.f32 0.0078125, %v33_v16 }
 0x128   :  { %v35_v18 = vadd.f32 1e-06, %v34_v17 }
 0x12a   :  { %232 = vrsqrt.f32 %v35_v18 }
 0x134   :  { %v233_v19 = vpop.eup %232 }
 0x135   :  { %v37_v21 = vmul.f32 %v233_v19, %v29_v7 }
 0x137   :  { %v45_v23 = vmul.f32 %v181_v20, %v37_v21 }
 0x139   :  { %v53_v24 = vadd.f32 %v182_v22, %v45_v23 }
 0x13b   :  { %v54_v25 = vpack.c.bf16 %v53_v24, %v53_v24 }
 0x13d   :  { %218 = vmatmul.mubr.bf16.vlgmr.msra.gmra.mrb[0].mxu0 %v54_v25 }
 0x210   :  { %v160_v27 = vpop.f32.mrb[0].mxu0 }
 0x211   :  { %v161_v28 = vadd.f32 %v183_v26, %v160_v27  ;;  %v219_v29 = vpop.f32.mrb[1].mxu0 }
 0x212   :  { %v163_v30 = vpop.f32.mrb[2].mxu0 }
 0x213   :  { %166 = vst [vmem:[#allocation2] sm:$0x3] %v161_v28  ;;  %v220_v31 = vpop.f32.mrb[3].mxu0 }
 0x214   :  { %245 = shalt.err (!%p242_p4)
}
 0x215   :  { %s246_s4 = scalar_lea.hbm %s346_s5, 32 }
 0x216   :  { %p247_p5 = scmp.ne.s32.totalorder %s346_s5, %s246_s4  ;;  %p250_p6 = scmp.lt.u32.totalorder %s246_s4, %s346_s5 }
 0x218   :  { %p252_p7 = pnand %p250_p6, %p247_p5 }
 0x21a   :  { %255 = shalt.err (!%p252_p7)
}
 0x21b   :  { %176 = dma.vmem_to_hbm [thread:$0]  %s174_s16, 32, %s346_s5, [#allocation3]  }
 0x21c   :  { %256 = dma.done.wait [#allocation3], 32  }
 0x21d   :  { %257 = vsyncadd [#allocation3], 4294967264 }
 0x21e   :  { %180 = vsyncpa [#allocation3], 1 }

// kernel: vit_linear_forward.16
= control target key start
LH: loop header
LB: loop body
LE: loop exit
PB: predicated region body
PF: predicated region fallthrough
CT: control target
= control target key end

     0   :  { %vm25_vm0 = vcmask 1041408   ;;  %v316_v23 = vmov 0   ;;  %v86_v46 = vlaneseq  ;;  %s418_s0 = inlined_call_operand.vmem [shape: f32[10,128], index: 0, kind: input, shape index: {}]   ;;  %s419_s3 = inlined_call_operand.vmem [shape: bf16[128,256], index: 3, kind: input, shape index: {}]   ;;  %s420_s1 = inlined_call_operand.vmem [shape: f32[1,128], index: 1, kind: input, shape index: {}]   ;;  %s421_s2 = inlined_call_operand.vmem [shape: f32[1,128], index: 2, kind: input, shape index: {}]   ;;  %s422_s4 = inlined_call_operand.vmem [shape: f32[1,256], index: 4, kind: input, shape index: {}]   ;;  %s423_s5 = inlined_call_operand.vmem [shape: bf16[10,256], index: 5, kind: output, shape index: {}]  }
   0x1   :  { %v22_v0 = vld [vmem:[%s418_s0 + $0x8] sm:$0x3]  ;;  %v21_v2 = vld [vmem:[%s418_s0] sm:$0xff]  ;;  %v283_v5 = vld [vmem:[%s419_s3 + $0x14] ss:$8 sps:$4 sm:$0xff]   ;;  %208 = vmatprep.mubr.bf16.mxu0 %v316_v23 }
   0x2   :  { %v26_v1 = vsel %vm25_vm0, %v22_v0, 0.0  ;;  %v280_v3 = vld [vmem:[%s419_s3 + $0x4] ss:$8 sps:$4 sm:$0xff]   ;;  %v282_v4 = vld [vmem:[%s419_s3] ss:$8 sps:$4 sm:$0xff]   ;;  %v87_v47 = vshrl.u32 %v86_v46, 7 }
   0x3   :  { %27 = vadd.xlane.f32.xlu0 %v26_v1  ;;  %176 = vmatprep.subr.bf16.mxu0 %v280_v3  ;;  %v285_v15 = vld [vmem:[%s419_s3 + $0x10] ss:$8 sps:$4 sm:$0xff]   ;;  %v286_v16 = vld [vmem:[%s419_s3 + $0x24] ss:$8 sps:$4 sm:$0xff]   ;;  %v288_v17 = vld [vmem:[%s419_s3 + $0x20] ss:$8 sps:$4 sm:$0xff]  }
   0x4   :  { %177 = vmatpush1.bf16.msra.mxu0 %v282_v4  ;;  %v289_v18 = vld [vmem:[%s419_s3 + $0x34] ss:$8 sps:$4 sm:$0xff]   ;;  %v291_v19 = vld [vmem:[%s419_s3 + $0x30] ss:$8 sps:$4 sm:$0xff]   ;;  %v292_v20 = vld [vmem:[%s419_s3 + $0x44] ss:$8 sps:$4 sm:$0xff]  }
   0x5   :  { %178 = vmatprep.subr.bf16.mxu0 %v283_v5  ;;  %v294_v21 = vld [vmem:[%s419_s3 + $0x40] ss:$8 sps:$4 sm:$0xff]   ;;  %v295_v22 = vld [vmem:[%s419_s3 + $0x54] ss:$8 sps:$4 sm:$0xff]   ;;  %v297_v24 = vld [vmem:[%s419_s3 + $0x50] ss:$8 sps:$4 sm:$0xff]  }
   0x6   :  { %v298_v25 = vld [vmem:[%s419_s3 + $0x64] ss:$8 sps:$4 sm:$0xff]   ;;  %v300_v26 = vld [vmem:[%s419_s3 + $0x60] ss:$8 sps:$4 sm:$0xff]   ;;  %v301_v27 = vld [vmem:[%s419_s3 + $0x74] ss:$8 sps:$4 sm:$0xff]  }
   0x7   :  { %23 = vadd.xlane.f32.xlu0 %v21_v2  ;;  %v303_v28 = vld [vmem:[%s419_s3 + $0x70] ss:$8 sps:$4 sm:$0xff]   ;;  %v257_v37 = vld [vmem:[%s420_s1] ss:$0 sm:$0xff]  ;;  %v88_v48 = vsub.s32 0, %v87_v47  ;;  %v92_v50 = vsub.s32 1, %v87_v47 }
   0x8   :  { %179 = vmatpush1.bf16.msra.mxu0 %v285_v15  ;;  %v258_v41 = vld [vmem:[%s421_s2] ss:$0 sm:$0xff] }
   0x9   :  { %180 = vmatprep.subr.bf16.mxu0 %v286_v16  ;;  %v84_v49 = vld [vmem:[%s422_s4] sm:$0x3] }
   0xa   :  { %v89_v51 = vrot.slane %v84_v49, %v88_v48  ;;  %v93_v52 = vrot.slane %v84_v49, %v92_v50 }
   0xc   :  { %181 = vmatpush1.bf16.msra.mxu0 %v288_v17 }
   0xd   :  { %182 = vmatprep.subr.bf16.mxu0 %v289_v18 }
  0x10   :  { %183 = vmatpush1.bf16.msra.mxu0 %v291_v19 }
  0x11   :  { %184 = vmatprep.subr.bf16.mxu0 %v292_v20 }
  0x14   :  { %185 = vmatpush1.bf16.msra.mxu0 %v294_v21 }
  0x15   :  { %186 = vmatprep.subr.bf16.mxu0 %v295_v22 }
  0x18   :  { %187 = vmatpush1.bf16.msra.mxu0 %v297_v24 }
  0x19   :  { %188 = vmatprep.subr.bf16.mxu0 %v298_v25 }
  0x1c   :  { %189 = vmatpush1.bf16.msra.mxu0 %v300_v26 }
  0x1d   :  { %190 = vmatprep.subr.bf16.mxu0 %v301_v27 }
  0x20   :  { %191 = vmatpush1.bf16.msra.mxu0 %v303_v28 }
  0x90   :  { %v28_v6 = vpop.xlane.xlu0 %27 }
  0x91   :  { %v31_v7 = vmul.f32 0.0078125, %v28_v6 }
  0x93   :  { %v33_v10 = vsub.f32 %v22_v0, %v31_v7 }
  0x94   :  { %v24_v8 = vpop.xlane.xlu0 %23 }
  0x95   :  { %v30_v9 = vmul.f32 0.0078125, %v24_v8  ;;  %v35_v13 = vmul.f32 %v33_v10, %v33_v10 }
  0x97   :  { %v32_v11 = vsub.f32 %v21_v2, %v30_v9  ;;  %v38_v14 = vsel %vm25_vm0, %v35_v13, 0.0 }
  0x99   :  { %v34_v12 = vmul.f32 %v32_v11, %v32_v11 }
  0x9b   :  { %36 = vadd.xlane.f32.xlu1 %v34_v12 }
  0x9f   :  { %39 = vadd.xlane.f32.xlu1 %v38_v14 }
 0x128   :  { %v37_v29 = vpop.xlane.xlu1 %36 }
 0x129   :  { %v41_v30 = vmul.f32 0.0078125, %v37_v29 }
 0x12b   :  { %v43_v31 = vadd.f32 1e-06, %v41_v30 }
 0x12c   :  { %v40_v32 = vpop.xlane.xlu1 %39 }
 0x12d   :  { %304 = vrsqrt.f32 %v43_v31  ;;  %v42_v33 = vmul.f32 0.0078125, %v40_v32 }
 0x12f   :  { %v44_v34 = vadd.f32 1e-06, %v42_v33 }
 0x131   :  { %306 = vrsqrt.f32 %v44_v34 }
 0x137   :  { %v305_v35 = vpop.eup %304 }
 0x138   :  { %v47_v36 = vmul.f32 %v305_v35, %v32_v11 }
 0x13a   :  { %v56_v40 = vmul.f32 %v257_v37, %v47_v36 }
 0x13b   :  { %v307_v38 = vpop.eup %306 }
 0x13c   :  { %v48_v39 = vmul.f32 %v307_v38, %v33_v10  ;;  %v65_v43 = vadd.f32 %v258_v41, %v56_v40 }
 0x13e   :  { %v57_v42 = vmul.f32 %v257_v37, %v48_v39 }
 0x140   :  { %v66_v44 = vadd.f32 %v258_v41, %v57_v42 }
 0x142   :  { %v67_v45 = vpack.c.bf16 %v66_v44, %v65_v43 }
 0x144   :  { %209 = vmatmul.mubr.bf16.vlgmr.msra.gmra.mrb[0].mxu0 %v67_v45 }
 0x217   :  { %v210_v53 = vpop.f32.mrb[0].mxu0 }
 0x218   :  { %v211_v54 = vadd.f32 %v210_v53, %v89_v51  ;;  %v212_v55 = vpop.f32.mrb[1].mxu0 }
 0x219   :  { %v213_v56 = vadd.f32 %v212_v55, %v93_v52  ;;  %v214_v57 = vpop.f32.mrb[2].mxu0 }
 0x21a   :  { %v223_v58 = vmul.f32 0.70710677, %v211_v54  ;;  %v215_v59 = vadd.f32 %v214_v57, %v89_v51  ;;  %v216_v60 = vpop.f32.mrb[3].mxu0  ;;  %v219_v3 = vmul.f32 0.5, %v211_v54 }
 0x21b   :  { %v224_v61 = vmul.f32 0.70710677, %v213_v56  ;;  %v217_v62 = vadd.f32 %v216_v60, %v93_v52  ;;  %v220_v6 = vmul.f32 0.5, %v213_v56 }
 0x21c   :  { %308 = verf.f32 %v223_v58  ;;  %v225_v63 = vmul.f32 0.70710677, %v215_v59  ;;  %v221_v10 = vmul.f32 0.5, %v215_v59 }
 0x21d   :  { %310 = verf.f32 %v224_v61  ;;  %v226_v0 = vmul.f32 0.70710677, %v217_v62  ;;  %v222_v13 = vmul.f32 0.5, %v217_v62 }
 0x21e   :  { %312 = verf.f32 %v225_v63 }
 0x21f   :  { %314 = verf.f32 %v226_v0 }
 0x226   :  { %v309_v1 = vpop.eup %308 }
 0x227   :  { %v311_v2 = vpop.eup %310  ;;  %v231_v4 = vadd.f32 1.0, %v309_v1 }
 0x228   :  { %v313_v5 = vpop.eup %312  ;;  %v232_v7 = vadd.f32 1.0, %v311_v2 }
 0x229   :  { %v315_v8 = vpop.eup %314  ;;  %v235_v9 = vmul.f32 %v231_v4, %v219_v3  ;;  %v233_v11 = vadd.f32 1.0, %v313_v5 }
 0x22a   :  { %v236_v12 = vmul.f32 %v232_v7, %v220_v6  ;;  %v234_v14 = vadd.f32 1.0, %v315_v8 }
 0x22b   :  { %v237_v15 = vmul.f32 %v233_v11, %v221_v10 }
 0x22c   :  { %v277_v16 = vpack.c.bf16 %v236_v12, %v235_v9  ;;  %v238_v17 = vmul.f32 %v234_v14, %v222_v13 }
 0x22e   :  { %251 = vst [vmem:[%s423_s5] sm:$0xff] %v277_v16  ;;  %v278_v18 = vpack.c.bf16 %v238_v17, %v237_v15 }
 0x230   :  { %252 = vst [vmem:[%s423_s5 + $0x8] sm:$0x11] %v278_v18 }

// kernel: vit_linear_forward.17
= control target key start
LH: loop header
LB: loop body
LE: loop exit
PB: predicated region body
PF: predicated region fallthrough
CT: control target
= control target key end

     0   :  { %s370_s1 = inlined_call_operand.vmem [shape: bf16[256,128], index: 1, kind: input, shape index: {}]   ;;  %s371_s0 = inlined_call_operand.vmem [shape: bf16[10,256], index: 0, kind: input, shape index: {}]   ;;  %s372_s2 = inlined_call_operand.vmem [shape: f32[1,128], index: 2, kind: input, shape index: {}]   ;;  %s373_s3 = inlined_call_operand.vmem [shape: f32[10,128], index: 3, kind: input, shape index: {}]   ;;  %s374_s4 = inlined_call_operand.vmem [shape: f32[10,128], index: 4, kind: output, shape index: {}]  }
   0x1   :  { %v257_v0 = vld [vmem:[%s370_s1 + $0x40] sm:$0xff]   ;;  %v259_v2 = vld [vmem:[%s370_s1 + $0x48] sm:$0xff]   ;;  %v261_v4 = vld [vmem:[%s370_s1 + $0x50] sm:$0xff]  }
   0x2   :  { %v258_v1 = vld [vmem:[%s370_s1] sm:$0xff]   ;;  %235 = vmatprep.subr.bf16.mxu0 %v257_v0  ;;  %v260_v3 = vld [vmem:[%s370_s1 + $0x8] sm:$0xff]   ;;  %v262_v5 = vld [vmem:[%s370_s1 + $0x10] sm:$0xff]  }
   0x3   :  { %236 = vmatpush3.bf16.msra.mxu0 %v258_v1  ;;  %v263_v6 = vld [vmem:[%s370_s1 + $0x58] sm:$0xff]   ;;  %v265_v8 = vld [vmem:[%s370_s1 + $0x60] sm:$0xff]   ;;  %v267_v10 = vld [vmem:[%s370_s1 + $0x68] sm:$0xff]  }
   0x4   :  { %237 = vmatprep.subr.bf16.mxu0 %v259_v2  ;;  %v264_v7 = vld [vmem:[%s370_s1 + $0x18] sm:$0xff]   ;;  %v266_v9 = vld [vmem:[%s370_s1 + $0x20] sm:$0xff]   ;;  %v268_v12 = vld [vmem:[%s370_s1 + $0x28] sm:$0xff]  }
   0x5   :  { %v275_v11 = vld [vmem:[%s371_s0 + $0x4] ss:$8 sps:$4 sm:$0x1f]   ;;  %v269_v13 = vld [vmem:[%s370_s1 + $0x70] sm:$0xff]   ;;  %v271_v15 = vld [vmem:[%s370_s1 + $0x78] sm:$0xff]  }
   0x6   :  { %197 = vmatprep.mubr.bf16.mxu0 %v275_v11  ;;  %v270_v14 = vld [vmem:[%s370_s1 + $0x30] sm:$0xff]   ;;  %v272_v16 = vld [vmem:[%s370_s1 + $0x38] sm:$0xff]   ;;  %v273_v17 = vld [vmem:[%s371_s0] ss:$8 sps:$4 sm:$0x1f]  }
   0x7   :  { %238 = vmatpush3.bf16.msra.mxu0 %v260_v3  ;;  %v216_v19 = vld [vmem:[%s372_s2] ss:$0 sm:$0xff]  ;;  %v207_v27 = vld [vmem:[%s373_s3 + $0x8] sm:$0x3] }
   0x8   :  { %239 = vmatprep.subr.bf16.mxu0 %v261_v4  ;;  %v206_v23 = vld [vmem:[%s373_s3] sm:$0xff] }
   0xb   :  { %240 = vmatpush3.bf16.msra.mxu0 %v262_v5 }
   0xc   :  { %241 = vmatprep.subr.bf16.mxu0 %v263_v6 }
   0xf   :  { %242 = vmatpush3.bf16.msra.mxu0 %v264_v7 }
  0x10   :  { %243 = vmatprep.subr.bf16.mxu0 %v265_v8 }
  0x13   :  { %244 = vmatpush3.bf16.msra.mxu0 %v266_v9 }
  0x14   :  { %245 = vmatprep.subr.bf16.mxu0 %v267_v10 }
  0x17   :  { %246 = vmatpush3.bf16.msra.mxu0 %v268_v12 }
  0x18   :  { %247 = vmatprep.subr.bf16.mxu0 %v269_v13 }
  0x1b   :  { %248 = vmatpush3.bf16.msra.mxu0 %v270_v14 }
  0x1c   :  { %249 = vmatprep.subr.bf16.mxu0 %v271_v15 }
  0x1f   :  { %250 = vmatpush3.bf16.msra.mxu0 %v272_v16 }
  0x22   :  { %198 = vmatmul.mubr.bf16.vlgmr.msra.gmra.mrb[0].mxu0 %v273_v17 }
  0xf5   :  { %v251_v18 = vpop.f32.mrb[0].mxu0 }
  0xf6   :  { %v252_v20 = vpop.f32.mrb[1].mxu0 }
  0xf7   :  { %v253_v21 = vadd.f32 %v252_v20, %v251_v18  ;;  %v254_v22 = vpop.f32.mrb[2].mxu0 }
  0xf8   :  { %v255_v24 = vpop.f32.mrb[3].mxu0 }
  0xf9   :  { %v200_v25 = vadd.f32 %v253_v21, %v216_v19  ;;  %v256_v26 = vadd.f32 %v255_v24, %v254_v22 }
  0xfb   :  { %v208_v28 = vadd.f32 %v206_v23, %v200_v25  ;;  %v203_v29 = vadd.f32 %v256_v26, %v216_v19 }
  0xfd   :  { %210 = vst [vmem:[%s374_s4] sm:$0xff] %v208_v28  ;;  %v209_v30 = vadd.f32 %v207_v27, %v203_v29 }
  0xff   :  { %211 = vst [vmem:[%s374_s4 + $0x8] sm:$0x3] %v209_v30 }

</bundles_post_ra>
